<compile_context>
chip_gen: v7x
topology: tpu7x:2x2x1
jax: 0.10.0
libtpu: 0.0.40
codegen_flags: <defaults>
</compile_context>

<pallas_src>
import jax
import jax.numpy as jnp
import numpy as np
from jax.experimental import pallas as pl
from jax.experimental.pallas import tpu as pltpu


IN_CHANNELS = 4
CFG = [8, 8, "M", 16, 16, "M"]   # scaled-down VGG "features" config


# ------------------------- in-kernel building blocks -------------------------
def _conv3x3_relu(act, w_ref, b_ref, H, W):
    """3x3 conv (pad=1, stride=1) + bias + ReLU in (C, B*H*W) layout.

    act:   (Cin, L) value, L = B*H*W; lanes are image-major / row-major spatial.
    w_ref: (9, Cout, Cin) VMEM ref, tap-major (k = 3*dy + dx).
    b_ref: (Cout, 1) VMEM ref.
    Returns (Cout, L) f32.
    """
    _, L = act.shape
    hw = H * W
    s = jax.lax.broadcasted_iota(jnp.int32, (1, L), 1)
    t = s % hw                                   # within-image flat spatial index
    c = t % W                                    # within-row column index
    f32 = act.dtype
    row_lo = (t >= W).astype(f32)                # input row y-1 exists
    row_hi = (t < (H - 1) * W).astype(f32)       # input row y+1 exists
    col_lo = (c >= 1).astype(f32)                # input col x-1 exists
    col_hi = (c <= W - 2).astype(f32)            # input col x+1 exists

    acc = None
    for dy in range(3):
        for dx in range(3):
            off = (dy - 1) * W + (dx - 1)        # lane offset of this tap's input
            src = act if off == 0 else pltpu.roll(act, shift=(-off) % L, axis=1)
            mask = None
            if dy == 0:
                mask = row_lo
            elif dy == 2:
                mask = row_hi
            if dx == 0:
                mask = col_lo if mask is None else mask * col_lo
            elif dx == 2:
                mask = col_hi if mask is None else mask * col_hi
            if mask is not None:
                src = src * mask                 # zero wrapped / padding lanes
            d = jnp.dot(w_ref[3 * dy + dx], src,
                        preferred_element_type=jnp.float32)
            acc = d if acc is None else acc + d
    return jnp.maximum(acc + b_ref[...], 0.0)


def _maxpool2x2(act, sel_ref, W):
    """MaxPool2d(2, 2) in (C, B*H*W) layout.

    Row/col pairing via lane rolls + max; lane compaction (keep even-y/even-x
    positions contiguously) via a 0/1 selection matmul on the idle MXU.
    Wrapped lanes are garbage but are killed by all-zero rows of sel_ref.
    """
    _, L = act.shape
    v = jnp.maximum(act, pltpu.roll(act, shift=L - W, axis=1))   # max(x[s], x[s+W])
    h = jnp.maximum(v, pltpu.roll(v, shift=L - 1, axis=1))       # max(., .[s+1])
    return jnp.dot(h, sel_ref[...], preferred_element_type=jnp.float32)


# --------------------------- fused features kernel ---------------------------
def _features_shapes(cfg, in_ch, H, W):
    conv_dims, pool_dims = [], []
    h, w, c = H, W, in_ch
    for v in cfg:
        if v == "M":
            pool_dims.append((h, w))
            h, w = h // 2, w // 2
        else:
            conv_dims.append((h, w, c, v))
            c = v
    return conv_dims, pool_dims, (h, w, c)


def _make_kernel(cfg, H0, W0):
    n_conv = sum(1 for v in cfg if v != "M")
    n_pool = sum(1 for v in cfg if v == "M")

    def kernel(x_ref, *refs):
        wb = refs[:2 * n_conv]                        # w1, b1, w2, b2, ...
        sels = refs[2 * n_conv:2 * n_conv + n_pool]   # pool selection matrices
        o_ref = refs[2 * n_conv + n_pool]
        act = x_ref[0]                                # (C0, B*H0*W0)
        h, w = H0, W0
        ci = pi = 0
        for v in cfg:
            if v == "M":
                act = _maxpool2x2(act, sels[pi], w)
                pi += 1
                h, w = h // 2, w // 2
            else:
                act = _conv3x3_relu(act, wb[2 * ci], wb[2 * ci + 1], h, w)
                ci += 1
        o_ref[0] = act.astype(o_ref.dtype)

    return kernel


# --------------------------------- wrapper -----------------------------------
def _pool_select_matrix(H, W, B):
    """(B*H*W, B*(H//2)*(W//2)) 0/1 matrix: column (b,yo,xo) selects lane
    (b, 2*yo, 2*xo). Compacts pooled lanes with one MXU matmul."""
    hw, ho, wo = H * W, H // 2, W // 2
    howo = ho * wo
    S = np.zeros((B * hw, B * howo), np.float32)
    for b in range(B):
        for yo in range(ho):
            for xo in range(wo):
                S[b * hw + (2 * yo) * W + 2 * xo, b * howo + yo * wo + xo] = 1.0
    return jnp.asarray(S)


def _images_per_block(n):
    """v7x has 2 TensorCores/chip -> keep a 2-way 'parallel' grid.
    v5e/v6e are single-TC -> collapse the batch into one fat grid step."""
    try:
        kind = jax.devices()[0].device_kind.lower()
    except Exception:
        kind = ""
    if "v7" in kind or "7x" in kind:
        return 1 if n > 1 else n
    return n


def net_forward(x_nchw, params, images_per_block=None):
    """Equivalent of net.forward (the VGG `features` stack). NCHW in/out."""
    N, C0, H, W = x_nchw.shape
    B = _images_per_block(N) if images_per_block is None else images_per_block
    assert N % B == 0
    NB = N // B
    conv_dims, pool_dims, (Hf, Wf, Cf) = _features_shapes(CFG, C0, H, W)

    # Host-side relayout (tiny, one XLA op): lane-dense channels-in-sublanes
    # blocks (NB, C0, B*H*W), image-major within lanes.
    x = (x_nchw.reshape(NB, B, C0, H * W)
               .transpose(0, 2, 1, 3)
               .reshape(NB, C0, B * H * W))

    flat_args = []
    in_specs = [pl.BlockSpec((1, C0, B * H * W), lambda g: (g, 0, 0))]
    # Weight-stationary taps: w9[3*dy+dx, co, ci] = w[dy, dx, ci, co].
    for (w, b), (_, _, cin, cout) in zip(params, conv_dims):
        w9 = jnp.transpose(w, (0, 1, 3, 2)).reshape(9, cout, cin)
        flat_args += [w9, b.reshape(cout, 1)]
        in_specs += [pl.BlockSpec((9, cout, cin), lambda g: (0, 0, 0)),
                     pl.BlockSpec((cout, 1), lambda g: (0, 0))]
    # Pool compaction matrices (stay resident in VMEM: constant index_map).
    for (h, w_) in pool_dims:
        S = _pool_select_matrix(h, w_, B)
        flat_args.append(S)
        in_specs.append(pl.BlockSpec(S.shape, lambda g: (0, 0)))

    out = pl.pallas_call(
        _make_kernel(CFG, H, W),
        out_shape=jax.ShapeDtypeStruct((NB, Cf, B * Hf * Wf), jnp.float32),
        grid=(NB,),
        in_specs=in_specs,
        out_specs=pl.BlockSpec((1, Cf, B * Hf * Wf), lambda g: (g, 0, 0)),
        compiler_params=pltpu.CompilerParams(
            dimension_semantics=("parallel",)),
    )(x, *flat_args)

    # Back to NCHW.
    return (out.reshape(NB, Cf, B, Hf * Wf)
               .transpose(0, 2, 1, 3)
               .reshape(N, Cf, Hf, Wf))


# ----------------------------- params & reference -----------------------------
def init_params(key):
    params = []
    cin = IN_CHANNELS
    for v in CFG:
        if v == "M":
            continue
        key, kw, kb = jax.random.split(key, 3)
        fan_in = 9 * cin
        w = jax.random.normal(kw, (3, 3, cin, v), jnp.float32) * (2.0 / fan_in) ** 0.5
        b = 0.01 * jax.random.normal(kb, (v,), jnp.float32)
        params.append((w, b))
        cin = v
    return params


def net_forward_ref(x_nchw, params):
    """Pure-JAX reference (correctness check only)."""
    x = jnp.transpose(x_nchw, (0, 2, 3, 1))
    pi = 0
    for v in CFG:
        if v == "M":
            x = jax.lax.reduce_window(
                x, -jnp.inf, jax.lax.max,
                window_dimensions=(1, 2, 2, 1),
                window_strides=(1, 2, 2, 1),
                padding="VALID")
        else:
            w, b = params[pi]
            pi += 1
            x = jax.lax.conv_general_dilated(
                x, w, window_strides=(1, 1), padding=((1, 1), (1, 1)),
                dimension_numbers=("NHWC", "HWIO", "NHWC"))
            x = jnp.maximum(x + b, 0.0)
    return jnp.transpose(x, (0, 3, 1, 2))


if __name__ == "__main__":
    key = jax.random.PRNGKey(0)
    key, kx = jax.random.split(key)
    x = jax.random.normal(kx, (2, IN_CHANNELS, 16, 16), jnp.float32)  # NCHW like torch

    params = init_params(key)
    ref = net_forward_ref(x, params)

    # Exercise both generation-specific batch layouts explicitly:
    #   B=1 -> 2-way "parallel" grid (v7x megacore), B=2 -> batch collapsed
    #   into lanes, single fat step (v5e/v6e).
    for b in (1, 2):
        out = jax.block_until_ready(net_forward(x, params, images_per_block=b))
        assert out.shape == (2, 16, 4, 4), out.shape
        assert jnp.allclose(out, ref, atol=1e-3, rtol=1e-3), f"mismatch (B={b})"

    # Default path: auto-picks the layout from the detected device kind.
    out = jax.block_until_ready(net_forward(x, params))
    assert jnp.allclose(out, ref, atol=1e-3, rtol=1e-3), "mismatch (auto)"

    print("KERNEL_OK")
</pallas_src>

<mosaic_0001>
module attributes {stable_mosaic.version = 11 : i64} {
  func.func @kernel(%arg0: i32, %arg1: memref<1x4x256xf32, #tpu.memory_space<vmem>>, %arg2: memref<9x8x4xf32, #tpu.memory_space<vmem>>, %arg3: memref<8x1xf32, #tpu.memory_space<vmem>>, %arg4: memref<9x8x8xf32, #tpu.memory_space<vmem>>, %arg5: memref<8x1xf32, #tpu.memory_space<vmem>>, %arg6: memref<9x16x8xf32, #tpu.memory_space<vmem>>, %arg7: memref<16x1xf32, #tpu.memory_space<vmem>>, %arg8: memref<9x16x16xf32, #tpu.memory_space<vmem>>, %arg9: memref<16x1xf32, #tpu.memory_space<vmem>>, %arg10: memref<256x64xf32, #tpu.memory_space<vmem>>, %arg11: memref<64x16xf32, #tpu.memory_space<vmem>>, %arg12: memref<1x16x16xf32, #tpu.memory_space<vmem>>) attributes {dimension_semantics = [#tpu.dimension_semantics<parallel>], iteration_bounds = array<i64: 2>, scalar_prefetch = 0 : i64, scratch_operands = 0 : i64, tpu.core_type = #tpu.core_type<tc>, window_params = [{transform_indices = @transform_0, window_bounds = array<i64: 1, 4, 256>}, {pipeline_mode = #tpu.pipeline_mode<synchronous>, transform_indices = @transform_1, window_bounds = array<i64: 9, 8, 4>}, {pipeline_mode = #tpu.pipeline_mode<synchronous>, transform_indices = @transform_2, window_bounds = array<i64: 8, 1>}, {pipeline_mode = #tpu.pipeline_mode<synchronous>, transform_indices = @transform_3, window_bounds = array<i64: 9, 8, 8>}, {pipeline_mode = #tpu.pipeline_mode<synchronous>, transform_indices = @transform_4, window_bounds = array<i64: 8, 1>}, {pipeline_mode = #tpu.pipeline_mode<synchronous>, transform_indices = @transform_5, window_bounds = array<i64: 9, 16, 8>}, {pipeline_mode = #tpu.pipeline_mode<synchronous>, transform_indices = @transform_6, window_bounds = array<i64: 16, 1>}, {pipeline_mode = #tpu.pipeline_mode<synchronous>, transform_indices = @transform_7, window_bounds = array<i64: 9, 16, 16>}, {pipeline_mode = #tpu.pipeline_mode<synchronous>, transform_indices = @transform_8, window_bounds = array<i64: 16, 1>}, {pipeline_mode = #tpu.pipeline_mode<synchronous>, transform_indices = @transform_9, window_bounds = array<i64: 256, 64>}, {pipeline_mode = #tpu.pipeline_mode<synchronous>, transform_indices = @transform_10, window_bounds = array<i64: 64, 16>}, {transform_indices = @transform_11, window_bounds = array<i64: 1, 16, 16>}]} {
    %c0 = arith.constant 0 : index
    %c0_0 = arith.constant 0 : index
    %c0_1 = arith.constant 0 : index
    %0 = vector.load %arg1[%c0, %c0_0, %c0_1] : memref<1x4x256xf32, #tpu.memory_space<vmem>>, vector<1x4x256xf32>
    %1 = vector.shape_cast %0 : vector<1x4x256xf32> to vector<4x256xf32>
    %2 = tpu.iota {dimensions = array<i32: 1>} : vector<1x256xi32>
    %c256_i32 = arith.constant 256 : i32
    %c0_i32 = arith.constant 0 : i32
    %3 = arith.cmpi eq, %c256_i32, %c0_i32 : i32
    %c1_i32 = arith.constant 1 : i32
    %4 = arith.select %3, %c1_i32, %c256_i32 : i32
    %5 = vector.broadcast %4 : i32 to vector<1x256xi32>
    %6 = arith.remsi %2, %5 : vector<1x256xi32>
    %c0_i32_2 = arith.constant 0 : i32
    %7 = vector.broadcast %c0_i32_2 : i32 to vector<1x256xi32>
    %8 = arith.cmpi ne, %6, %7 : vector<1x256xi32>
    %c0_i32_3 = arith.constant 0 : i32
    %9 = vector.broadcast %c0_i32_3 : i32 to vector<1x256xi32>
    %10 = arith.cmpi slt, %6, %9 : vector<1x256xi32>
    %c0_i32_4 = arith.constant 0 : i32
    %11 = arith.cmpi slt, %4, %c0_i32_4 : i32
    %12 = vector.broadcast %11 : i1 to vector<1x256xi1>
    %13 = vector.broadcast %12 : vector<1x256xi1> to vector<1x256xi1>
    %14 = arith.xori %10, %13 : vector<1x256xi1>
    %15 = arith.andi %14, %8 : vector<1x256xi1>
    %16 = vector.broadcast %4 : i32 to vector<1x256xi32>
    %17 = arith.addi %6, %16 : vector<1x256xi32>
    %18 = arith.select %15, %17, %6 : vector<1x256xi1>, vector<1x256xi32>
    %c16_i32 = arith.constant 16 : i32
    %c0_i32_5 = arith.constant 0 : i32
    %19 = arith.cmpi eq, %c16_i32, %c0_i32_5 : i32
    %c1_i32_6 = arith.constant 1 : i32
    %20 = arith.select %19, %c1_i32_6, %c16_i32 : i32
    %21 = vector.broadcast %20 : i32 to vector<1x256xi32>
    %22 = arith.remsi %18, %21 : vector<1x256xi32>
    %c0_i32_7 = arith.constant 0 : i32
    %23 = vector.broadcast %c0_i32_7 : i32 to vector<1x256xi32>
    %24 = arith.cmpi ne, %22, %23 : vector<1x256xi32>
    %c0_i32_8 = arith.constant 0 : i32
    %25 = vector.broadcast %c0_i32_8 : i32 to vector<1x256xi32>
    %26 = arith.cmpi slt, %22, %25 : vector<1x256xi32>
    %c0_i32_9 = arith.constant 0 : i32
    %27 = arith.cmpi slt, %20, %c0_i32_9 : i32
    %28 = vector.broadcast %27 : i1 to vector<1x256xi1>
    %29 = vector.broadcast %28 : vector<1x256xi1> to vector<1x256xi1>
    %30 = arith.xori %26, %29 : vector<1x256xi1>
    %31 = arith.andi %30, %24 : vector<1x256xi1>
    %32 = vector.broadcast %20 : i32 to vector<1x256xi32>
    %33 = arith.addi %22, %32 : vector<1x256xi32>
    %34 = arith.select %31, %33, %22 : vector<1x256xi1>, vector<1x256xi32>
    %c16_i32_10 = arith.constant 16 : i32
    %35 = vector.broadcast %c16_i32_10 : i32 to vector<1x256xi32>
    %36 = arith.cmpi sge, %18, %35 : vector<1x256xi32>
    %37 = arith.extui %36 : vector<1x256xi1> to vector<1x256xi32>
    %38 = arith.sitofp %37 : vector<1x256xi32> to vector<1x256xf32>
    %c240_i32 = arith.constant 240 : i32
    %39 = vector.broadcast %c240_i32 : i32 to vector<1x256xi32>
    %40 = arith.cmpi slt, %18, %39 : vector<1x256xi32>
    %41 = arith.extui %40 : vector<1x256xi1> to vector<1x256xi32>
    %42 = arith.sitofp %41 : vector<1x256xi32> to vector<1x256xf32>
    %c1_i32_11 = arith.constant 1 : i32
    %43 = vector.broadcast %c1_i32_11 : i32 to vector<1x256xi32>
    %44 = arith.cmpi sge, %34, %43 : vector<1x256xi32>
    %45 = arith.extui %44 : vector<1x256xi1> to vector<1x256xi32>
    %46 = arith.sitofp %45 : vector<1x256xi32> to vector<1x256xf32>
    %c14_i32 = arith.constant 14 : i32
    %47 = vector.broadcast %c14_i32 : i32 to vector<1x256xi32>
    %48 = arith.cmpi sle, %34, %47 : vector<1x256xi32>
    %49 = arith.extui %48 : vector<1x256xi1> to vector<1x256xi32>
    %50 = arith.sitofp %49 : vector<1x256xi32> to vector<1x256xf32>
    %c17_i32 = arith.constant 17 : i32
    %51 = tpu.dynamic_rotate %1 by %c17_i32 dim 1 : vector<4x256xf32>, i32 -> vector<4x256xf32>
    %52 = arith.mulf %38, %46 : vector<1x256xf32>
    %53 = vector.broadcast %52 : vector<1x256xf32> to vector<4x256xf32>
    %54 = arith.mulf %51, %53 : vector<4x256xf32>
    %c0_12 = arith.constant 0 : index
    %c0_13 = arith.constant 0 : index
    %c0_14 = arith.constant 0 : index
    %55 = vector.load %arg2[%c0_12, %c0_13, %c0_14] : memref<9x8x4xf32, #tpu.memory_space<vmem>>, vector<1x8x4xf32>
    %56 = vector.shape_cast %55 : vector<1x8x4xf32> to vector<8x4xf32>
    %cst = arith.constant dense<0.000000e+00> : vector<8x256xf32>
    %57 = tpu.matmul %56, %54, %cst {dimension_numbers = #tpu.dot_dimension_numbers<[1], [0], [0], [1], [0, 0, 1, 1], [], []>} : vector<8x4xf32>, vector<4x256xf32>, vector<8x256xf32> -> vector<8x256xf32>
    %c16_i32_15 = arith.constant 16 : i32
    %58 = tpu.dynamic_rotate %1 by %c16_i32_15 dim 1 : vector<4x256xf32>, i32 -> vector<4x256xf32>
    %59 = vector.broadcast %38 : vector<1x256xf32> to vector<4x256xf32>
    %60 = arith.mulf %58, %59 : vector<4x256xf32>
    %c1 = arith.constant 1 : index
    %c0_16 = arith.constant 0 : index
    %c0_17 = arith.constant 0 : index
    %61 = vector.load %arg2[%c1, %c0_16, %c0_17] : memref<9x8x4xf32, #tpu.memory_space<vmem>>, vector<1x8x4xf32>
    %62 = vector.shape_cast %61 : vector<1x8x4xf32> to vector<8x4xf32>
    %cst_18 = arith.constant dense<0.000000e+00> : vector<8x256xf32>
    %63 = tpu.matmul %62, %60, %cst_18 {dimension_numbers = #tpu.dot_dimension_numbers<[1], [0], [0], [1], [0, 0, 1, 1], [], []>} : vector<8x4xf32>, vector<4x256xf32>, vector<8x256xf32> -> vector<8x256xf32>
    %64 = arith.addf %57, %63 : vector<8x256xf32>
    %c15_i32 = arith.constant 15 : i32
    %65 = tpu.dynamic_rotate %1 by %c15_i32 dim 1 : vector<4x256xf32>, i32 -> vector<4x256xf32>
    %66 = arith.mulf %38, %50 : vector<1x256xf32>
    %67 = vector.broadcast %66 : vector<1x256xf32> to vector<4x256xf32>
    %68 = arith.mulf %65, %67 : vector<4x256xf32>
    %c2 = arith.constant 2 : index
    %c0_19 = arith.constant 0 : index
    %c0_20 = arith.constant 0 : index
    %69 = vector.load %arg2[%c2, %c0_19, %c0_20] : memref<9x8x4xf32, #tpu.memory_space<vmem>>, vector<1x8x4xf32>
    %70 = vector.shape_cast %69 : vector<1x8x4xf32> to vector<8x4xf32>
    %cst_21 = arith.constant dense<0.000000e+00> : vector<8x256xf32>
    %71 = tpu.matmul %70, %68, %cst_21 {dimension_numbers = #tpu.dot_dimension_numbers<[1], [0], [0], [1], [0, 0, 1, 1], [], []>} : vector<8x4xf32>, vector<4x256xf32>, vector<8x256xf32> -> vector<8x256xf32>
    %72 = arith.addf %64, %71 : vector<8x256xf32>
    %c1_i32_22 = arith.constant 1 : i32
    %73 = tpu.dynamic_rotate %1 by %c1_i32_22 dim 1 : vector<4x256xf32>, i32 -> vector<4x256xf32>
    %74 = vector.broadcast %46 : vector<1x256xf32> to vector<4x256xf32>
    %75 = arith.mulf %73, %74 : vector<4x256xf32>
    %c3 = arith.constant 3 : index
    %c0_23 = arith.constant 0 : index
    %c0_24 = arith.constant 0 : index
    %76 = vector.load %arg2[%c3, %c0_23, %c0_24] : memref<9x8x4xf32, #tpu.memory_space<vmem>>, vector<1x8x4xf32>
    %77 = vector.shape_cast %76 : vector<1x8x4xf32> to vector<8x4xf32>
    %cst_25 = arith.constant dense<0.000000e+00> : vector<8x256xf32>
    %78 = tpu.matmul %77, %75, %cst_25 {dimension_numbers = #tpu.dot_dimension_numbers<[1], [0], [0], [1], [0, 0, 1, 1], [], []>} : vector<8x4xf32>, vector<4x256xf32>, vector<8x256xf32> -> vector<8x256xf32>
    %79 = arith.addf %72, %78 : vector<8x256xf32>
    %c4 = arith.constant 4 : index
    %c0_26 = arith.constant 0 : index
    %c0_27 = arith.constant 0 : index
    %80 = vector.load %arg2[%c4, %c0_26, %c0_27] : memref<9x8x4xf32, #tpu.memory_space<vmem>>, vector<1x8x4xf32>
    %81 = vector.shape_cast %80 : vector<1x8x4xf32> to vector<8x4xf32>
    %cst_28 = arith.constant dense<0.000000e+00> : vector<8x256xf32>
    %82 = tpu.matmul %81, %1, %cst_28 {dimension_numbers = #tpu.dot_dimension_numbers<[1], [0], [0], [1], [0, 0, 1, 1], [], []>} : vector<8x4xf32>, vector<4x256xf32>, vector<8x256xf32> -> vector<8x256xf32>
    %83 = arith.addf %79, %82 : vector<8x256xf32>
    %c255_i32 = arith.constant 255 : i32
    %84 = tpu.dynamic_rotate %1 by %c255_i32 dim 1 : vector<4x256xf32>, i32 -> vector<4x256xf32>
    %85 = vector.broadcast %50 : vector<1x256xf32> to vector<4x256xf32>
    %86 = arith.mulf %84, %85 : vector<4x256xf32>
    %c5 = arith.constant 5 : index
    %c0_29 = arith.constant 0 : index
    %c0_30 = arith.constant 0 : index
    %87 = vector.load %arg2[%c5, %c0_29, %c0_30] : memref<9x8x4xf32, #tpu.memory_space<vmem>>, vector<1x8x4xf32>
    %88 = vector.shape_cast %87 : vector<1x8x4xf32> to vector<8x4xf32>
    %cst_31 = arith.constant dense<0.000000e+00> : vector<8x256xf32>
    %89 = tpu.matmul %88, %86, %cst_31 {dimension_numbers = #tpu.dot_dimension_numbers<[1], [0], [0], [1], [0, 0, 1, 1], [], []>} : vector<8x4xf32>, vector<4x256xf32>, vector<8x256xf32> -> vector<8x256xf32>
    %90 = arith.addf %83, %89 : vector<8x256xf32>
    %c241_i32 = arith.constant 241 : i32
    %91 = tpu.dynamic_rotate %1 by %c241_i32 dim 1 : vector<4x256xf32>, i32 -> vector<4x256xf32>
    %92 = arith.mulf %42, %46 : vector<1x256xf32>
    %93 = vector.broadcast %92 : vector<1x256xf32> to vector<4x256xf32>
    %94 = arith.mulf %91, %93 : vector<4x256xf32>
    %c6 = arith.constant 6 : index
    %c0_32 = arith.constant 0 : index
    %c0_33 = arith.constant 0 : index
    %95 = vector.load %arg2[%c6, %c0_32, %c0_33] : memref<9x8x4xf32, #tpu.memory_space<vmem>>, vector<1x8x4xf32>
    %96 = vector.shape_cast %95 : vector<1x8x4xf32> to vector<8x4xf32>
    %cst_34 = arith.constant dense<0.000000e+00> : vector<8x256xf32>
    %97 = tpu.matmul %96, %94, %cst_34 {dimension_numbers = #tpu.dot_dimension_numbers<[1], [0], [0], [1], [0, 0, 1, 1], [], []>} : vector<8x4xf32>, vector<4x256xf32>, vector<8x256xf32> -> vector<8x256xf32>
    %98 = arith.addf %90, %97 : vector<8x256xf32>
    %c240_i32_35 = arith.constant 240 : i32
    %99 = tpu.dynamic_rotate %1 by %c240_i32_35 dim 1 : vector<4x256xf32>, i32 -> vector<4x256xf32>
    %100 = vector.broadcast %42 : vector<1x256xf32> to vector<4x256xf32>
    %101 = arith.mulf %99, %100 : vector<4x256xf32>
    %c7 = arith.constant 7 : index
    %c0_36 = arith.constant 0 : index
    %c0_37 = arith.constant 0 : index
    %102 = vector.load %arg2[%c7, %c0_36, %c0_37] : memref<9x8x4xf32, #tpu.memory_space<vmem>>, vector<1x8x4xf32>
    %103 = vector.shape_cast %102 : vector<1x8x4xf32> to vector<8x4xf32>
    %cst_38 = arith.constant dense<0.000000e+00> : vector<8x256xf32>
    %104 = tpu.matmul %103, %101, %cst_38 {dimension_numbers = #tpu.dot_dimension_numbers<[1], [0], [0], [1], [0, 0, 1, 1], [], []>} : vector<8x4xf32>, vector<4x256xf32>, vector<8x256xf32> -> vector<8x256xf32>
    %105 = arith.addf %98, %104 : vector<8x256xf32>
    %c239_i32 = arith.constant 239 : i32
    %106 = tpu.dynamic_rotate %1 by %c239_i32 dim 1 : vector<4x256xf32>, i32 -> vector<4x256xf32>
    %107 = arith.mulf %42, %50 : vector<1x256xf32>
    %108 = vector.broadcast %107 : vector<1x256xf32> to vector<4x256xf32>
    %109 = arith.mulf %106, %108 : vector<4x256xf32>
    %c8 = arith.constant 8 : index
    %c0_39 = arith.constant 0 : index
    %c0_40 = arith.constant 0 : index
    %110 = vector.load %arg2[%c8, %c0_39, %c0_40] : memref<9x8x4xf32, #tpu.memory_space<vmem>>, vector<1x8x4xf32>
    %111 = vector.shape_cast %110 : vector<1x8x4xf32> to vector<8x4xf32>
    %cst_41 = arith.constant dense<0.000000e+00> : vector<8x256xf32>
    %112 = tpu.matmul %111, %109, %cst_41 {dimension_numbers = #tpu.dot_dimension_numbers<[1], [0], [0], [1], [0, 0, 1, 1], [], []>} : vector<8x4xf32>, vector<4x256xf32>, vector<8x256xf32> -> vector<8x256xf32>
    %113 = arith.addf %105, %112 : vector<8x256xf32>
    %c0_42 = arith.constant 0 : index
    %c0_43 = arith.constant 0 : index
    %114 = vector.load %arg3[%c0_42, %c0_43] : memref<8x1xf32, #tpu.memory_space<vmem>>, vector<8x1xf32>
    %115 = vector.broadcast %114 : vector<8x1xf32> to vector<8x256xf32>
    %116 = arith.addf %113, %115 : vector<8x256xf32>
    %cst_44 = arith.constant 0.000000e+00 : f32
    %117 = vector.broadcast %cst_44 : f32 to vector<8x256xf32>
    %118 = arith.maximumf %116, %117 : vector<8x256xf32>
    %119 = tpu.iota {dimensions = array<i32: 1>} : vector<1x256xi32>
    %c256_i32_45 = arith.constant 256 : i32
    %c0_i32_46 = arith.constant 0 : i32
    %120 = arith.cmpi eq, %c256_i32_45, %c0_i32_46 : i32
    %c1_i32_47 = arith.constant 1 : i32
    %121 = arith.select %120, %c1_i32_47, %c256_i32_45 : i32
    %122 = vector.broadcast %121 : i32 to vector<1x256xi32>
    %123 = arith.remsi %119, %122 : vector<1x256xi32>
    %c0_i32_48 = arith.constant 0 : i32
    %124 = vector.broadcast %c0_i32_48 : i32 to vector<1x256xi32>
    %125 = arith.cmpi ne, %123, %124 : vector<1x256xi32>
    %c0_i32_49 = arith.constant 0 : i32
    %126 = vector.broadcast %c0_i32_49 : i32 to vector<1x256xi32>
    %127 = arith.cmpi slt, %123, %126 : vector<1x256xi32>
    %c0_i32_50 = arith.constant 0 : i32
    %128 = arith.cmpi slt, %121, %c0_i32_50 : i32
    %129 = vector.broadcast %128 : i1 to vector<1x256xi1>
    %130 = vector.broadcast %129 : vector<1x256xi1> to vector<1x256xi1>
    %131 = arith.xori %127, %130 : vector<1x256xi1>
    %132 = arith.andi %131, %125 : vector<1x256xi1>
    %133 = vector.broadcast %121 : i32 to vector<1x256xi32>
    %134 = arith.addi %123, %133 : vector<1x256xi32>
    %135 = arith.select %132, %134, %123 : vector<1x256xi1>, vector<1x256xi32>
    %c16_i32_51 = arith.constant 16 : i32
    %c0_i32_52 = arith.constant 0 : i32
    %136 = arith.cmpi eq, %c16_i32_51, %c0_i32_52 : i32
    %c1_i32_53 = arith.constant 1 : i32
    %137 = arith.select %136, %c1_i32_53, %c16_i32_51 : i32
    %138 = vector.broadcast %137 : i32 to vector<1x256xi32>
    %139 = arith.remsi %135, %138 : vector<1x256xi32>
    %c0_i32_54 = arith.constant 0 : i32
    %140 = vector.broadcast %c0_i32_54 : i32 to vector<1x256xi32>
    %141 = arith.cmpi ne, %139, %140 : vector<1x256xi32>
    %c0_i32_55 = arith.constant 0 : i32
    %142 = vector.broadcast %c0_i32_55 : i32 to vector<1x256xi32>
    %143 = arith.cmpi slt, %139, %142 : vector<1x256xi32>
    %c0_i32_56 = arith.constant 0 : i32
    %144 = arith.cmpi slt, %137, %c0_i32_56 : i32
    %145 = vector.broadcast %144 : i1 to vector<1x256xi1>
    %146 = vector.broadcast %145 : vector<1x256xi1> to vector<1x256xi1>
    %147 = arith.xori %143, %146 : vector<1x256xi1>
    %148 = arith.andi %147, %141 : vector<1x256xi1>
    %149 = vector.broadcast %137 : i32 to vector<1x256xi32>
    %150 = arith.addi %139, %149 : vector<1x256xi32>
    %151 = arith.select %148, %150, %139 : vector<1x256xi1>, vector<1x256xi32>
    %c16_i32_57 = arith.constant 16 : i32
    %152 = vector.broadcast %c16_i32_57 : i32 to vector<1x256xi32>
    %153 = arith.cmpi sge, %135, %152 : vector<1x256xi32>
    %154 = arith.extui %153 : vector<1x256xi1> to vector<1x256xi32>
    %155 = arith.sitofp %154 : vector<1x256xi32> to vector<1x256xf32>
    %c240_i32_58 = arith.constant 240 : i32
    %156 = vector.broadcast %c240_i32_58 : i32 to vector<1x256xi32>
    %157 = arith.cmpi slt, %135, %156 : vector<1x256xi32>
    %158 = arith.extui %157 : vector<1x256xi1> to vector<1x256xi32>
    %159 = arith.sitofp %158 : vector<1x256xi32> to vector<1x256xf32>
    %c1_i32_59 = arith.constant 1 : i32
    %160 = vector.broadcast %c1_i32_59 : i32 to vector<1x256xi32>
    %161 = arith.cmpi sge, %151, %160 : vector<1x256xi32>
    %162 = arith.extui %161 : vector<1x256xi1> to vector<1x256xi32>
    %163 = arith.sitofp %162 : vector<1x256xi32> to vector<1x256xf32>
    %c14_i32_60 = arith.constant 14 : i32
    %164 = vector.broadcast %c14_i32_60 : i32 to vector<1x256xi32>
    %165 = arith.cmpi sle, %151, %164 : vector<1x256xi32>
    %166 = arith.extui %165 : vector<1x256xi1> to vector<1x256xi32>
    %167 = arith.sitofp %166 : vector<1x256xi32> to vector<1x256xf32>
    %c17_i32_61 = arith.constant 17 : i32
    %168 = tpu.dynamic_rotate %118 by %c17_i32_61 dim 1 : vector<8x256xf32>, i32 -> vector<8x256xf32>
    %169 = arith.mulf %155, %163 : vector<1x256xf32>
    %170 = vector.broadcast %169 : vector<1x256xf32> to vector<8x256xf32>
    %171 = arith.mulf %168, %170 : vector<8x256xf32>
    %c0_62 = arith.constant 0 : index
    %c0_63 = arith.constant 0 : index
    %c0_64 = arith.constant 0 : index
    %172 = vector.load %arg4[%c0_62, %c0_63, %c0_64] : memref<9x8x8xf32, #tpu.memory_space<vmem>>, vector<1x8x8xf32>
    %173 = vector.shape_cast %172 : vector<1x8x8xf32> to vector<8x8xf32>
    %cst_65 = arith.constant dense<0.000000e+00> : vector<8x256xf32>
    %174 = tpu.matmul %173, %171, %cst_65 {dimension_numbers = #tpu.dot_dimension_numbers<[1], [0], [0], [1], [0, 0, 1, 1], [], []>} : vector<8x8xf32>, vector<8x256xf32>, vector<8x256xf32> -> vector<8x256xf32>
    %c16_i32_66 = arith.constant 16 : i32
    %175 = tpu.dynamic_rotate %118 by %c16_i32_66 dim 1 : vector<8x256xf32>, i32 -> vector<8x256xf32>
    %176 = vector.broadcast %155 : vector<1x256xf32> to vector<8x256xf32>
    %177 = arith.mulf %175, %176 : vector<8x256xf32>
    %c1_67 = arith.constant 1 : index
    %c0_68 = arith.constant 0 : index
    %c0_69 = arith.constant 0 : index
    %178 = vector.load %arg4[%c1_67, %c0_68, %c0_69] : memref<9x8x8xf32, #tpu.memory_space<vmem>>, vector<1x8x8xf32>
    %179 = vector.shape_cast %178 : vector<1x8x8xf32> to vector<8x8xf32>
    %cst_70 = arith.constant dense<0.000000e+00> : vector<8x256xf32>
    %180 = tpu.matmul %179, %177, %cst_70 {dimension_numbers = #tpu.dot_dimension_numbers<[1], [0], [0], [1], [0, 0, 1, 1], [], []>} : vector<8x8xf32>, vector<8x256xf32>, vector<8x256xf32> -> vector<8x256xf32>
    %181 = arith.addf %174, %180 : vector<8x256xf32>
    %c15_i32_71 = arith.constant 15 : i32
    %182 = tpu.dynamic_rotate %118 by %c15_i32_71 dim 1 : vector<8x256xf32>, i32 -> vector<8x256xf32>
    %183 = arith.mulf %155, %167 : vector<1x256xf32>
    %184 = vector.broadcast %183 : vector<1x256xf32> to vector<8x256xf32>
    %185 = arith.mulf %182, %184 : vector<8x256xf32>
    %c2_72 = arith.constant 2 : index
    %c0_73 = arith.constant 0 : index
    %c0_74 = arith.constant 0 : index
    %186 = vector.load %arg4[%c2_72, %c0_73, %c0_74] : memref<9x8x8xf32, #tpu.memory_space<vmem>>, vector<1x8x8xf32>
    %187 = vector.shape_cast %186 : vector<1x8x8xf32> to vector<8x8xf32>
    %cst_75 = arith.constant dense<0.000000e+00> : vector<8x256xf32>
    %188 = tpu.matmul %187, %185, %cst_75 {dimension_numbers = #tpu.dot_dimension_numbers<[1], [0], [0], [1], [0, 0, 1, 1], [], []>} : vector<8x8xf32>, vector<8x256xf32>, vector<8x256xf32> -> vector<8x256xf32>
    %189 = arith.addf %181, %188 : vector<8x256xf32>
    %c1_i32_76 = arith.constant 1 : i32
    %190 = tpu.dynamic_rotate %118 by %c1_i32_76 dim 1 : vector<8x256xf32>, i32 -> vector<8x256xf32>
    %191 = vector.broadcast %163 : vector<1x256xf32> to vector<8x256xf32>
    %192 = arith.mulf %190, %191 : vector<8x256xf32>
    %c3_77 = arith.constant 3 : index
    %c0_78 = arith.constant 0 : index
    %c0_79 = arith.constant 0 : index
    %193 = vector.load %arg4[%c3_77, %c0_78, %c0_79] : memref<9x8x8xf32, #tpu.memory_space<vmem>>, vector<1x8x8xf32>
    %194 = vector.shape_cast %193 : vector<1x8x8xf32> to vector<8x8xf32>
    %cst_80 = arith.constant dense<0.000000e+00> : vector<8x256xf32>
    %195 = tpu.matmul %194, %192, %cst_80 {dimension_numbers = #tpu.dot_dimension_numbers<[1], [0], [0], [1], [0, 0, 1, 1], [], []>} : vector<8x8xf32>, vector<8x256xf32>, vector<8x256xf32> -> vector<8x256xf32>
    %196 = arith.addf %189, %195 : vector<8x256xf32>
    %c4_81 = arith.constant 4 : index
    %c0_82 = arith.constant 0 : index
    %c0_83 = arith.constant 0 : index
    %197 = vector.load %arg4[%c4_81, %c0_82, %c0_83] : memref<9x8x8xf32, #tpu.memory_space<vmem>>, vector<1x8x8xf32>
    %198 = vector.shape_cast %197 : vector<1x8x8xf32> to vector<8x8xf32>
    %cst_84 = arith.constant dense<0.000000e+00> : vector<8x256xf32>
    %199 = tpu.matmul %198, %118, %cst_84 {dimension_numbers = #tpu.dot_dimension_numbers<[1], [0], [0], [1], [0, 0, 1, 1], [], []>} : vector<8x8xf32>, vector<8x256xf32>, vector<8x256xf32> -> vector<8x256xf32>
    %200 = arith.addf %196, %199 : vector<8x256xf32>
    %c255_i32_85 = arith.constant 255 : i32
    %201 = tpu.dynamic_rotate %118 by %c255_i32_85 dim 1 : vector<8x256xf32>, i32 -> vector<8x256xf32>
    %202 = vector.broadcast %167 : vector<1x256xf32> to vector<8x256xf32>
    %203 = arith.mulf %201, %202 : vector<8x256xf32>
    %c5_86 = arith.constant 5 : index
    %c0_87 = arith.constant 0 : index
    %c0_88 = arith.constant 0 : index
    %204 = vector.load %arg4[%c5_86, %c0_87, %c0_88] : memref<9x8x8xf32, #tpu.memory_space<vmem>>, vector<1x8x8xf32>
    %205 = vector.shape_cast %204 : vector<1x8x8xf32> to vector<8x8xf32>
    %cst_89 = arith.constant dense<0.000000e+00> : vector<8x256xf32>
    %206 = tpu.matmul %205, %203, %cst_89 {dimension_numbers = #tpu.dot_dimension_numbers<[1], [0], [0], [1], [0, 0, 1, 1], [], []>} : vector<8x8xf32>, vector<8x256xf32>, vector<8x256xf32> -> vector<8x256xf32>
    %207 = arith.addf %200, %206 : vector<8x256xf32>
    %c241_i32_90 = arith.constant 241 : i32
    %208 = tpu.dynamic_rotate %118 by %c241_i32_90 dim 1 : vector<8x256xf32>, i32 -> vector<8x256xf32>
    %209 = arith.mulf %159, %163 : vector<1x256xf32>
    %210 = vector.broadcast %209 : vector<1x256xf32> to vector<8x256xf32>
    %211 = arith.mulf %208, %210 : vector<8x256xf32>
    %c6_91 = arith.constant 6 : index
    %c0_92 = arith.constant 0 : index
    %c0_93 = arith.constant 0 : index
    %212 = vector.load %arg4[%c6_91, %c0_92, %c0_93] : memref<9x8x8xf32, #tpu.memory_space<vmem>>, vector<1x8x8xf32>
    %213 = vector.shape_cast %212 : vector<1x8x8xf32> to vector<8x8xf32>
    %cst_94 = arith.constant dense<0.000000e+00> : vector<8x256xf32>
    %214 = tpu.matmul %213, %211, %cst_94 {dimension_numbers = #tpu.dot_dimension_numbers<[1], [0], [0], [1], [0, 0, 1, 1], [], []>} : vector<8x8xf32>, vector<8x256xf32>, vector<8x256xf32> -> vector<8x256xf32>
    %215 = arith.addf %207, %214 : vector<8x256xf32>
    %c240_i32_95 = arith.constant 240 : i32
    %216 = tpu.dynamic_rotate %118 by %c240_i32_95 dim 1 : vector<8x256xf32>, i32 -> vector<8x256xf32>
    %217 = vector.broadcast %159 : vector<1x256xf32> to vector<8x256xf32>
    %218 = arith.mulf %216, %217 : vector<8x256xf32>
    %c7_96 = arith.constant 7 : index
    %c0_97 = arith.constant 0 : index
    %c0_98 = arith.constant 0 : index
    %219 = vector.load %arg4[%c7_96, %c0_97, %c0_98] : memref<9x8x8xf32, #tpu.memory_space<vmem>>, vector<1x8x8xf32>
    %220 = vector.shape_cast %219 : vector<1x8x8xf32> to vector<8x8xf32>
    %cst_99 = arith.constant dense<0.000000e+00> : vector<8x256xf32>
    %221 = tpu.matmul %220, %218, %cst_99 {dimension_numbers = #tpu.dot_dimension_numbers<[1], [0], [0], [1], [0, 0, 1, 1], [], []>} : vector<8x8xf32>, vector<8x256xf32>, vector<8x256xf32> -> vector<8x256xf32>
    %222 = arith.addf %215, %221 : vector<8x256xf32>
    %c239_i32_100 = arith.constant 239 : i32
    %223 = tpu.dynamic_rotate %118 by %c239_i32_100 dim 1 : vector<8x256xf32>, i32 -> vector<8x256xf32>
    %224 = arith.mulf %159, %167 : vector<1x256xf32>
    %225 = vector.broadcast %224 : vector<1x256xf32> to vector<8x256xf32>
    %226 = arith.mulf %223, %225 : vector<8x256xf32>
    %c8_101 = arith.constant 8 : index
    %c0_102 = arith.constant 0 : index
    %c0_103 = arith.constant 0 : index
    %227 = vector.load %arg4[%c8_101, %c0_102, %c0_103] : memref<9x8x8xf32, #tpu.memory_space<vmem>>, vector<1x8x8xf32>
    %228 = vector.shape_cast %227 : vector<1x8x8xf32> to vector<8x8xf32>
    %cst_104 = arith.constant dense<0.000000e+00> : vector<8x256xf32>
    %229 = tpu.matmul %228, %226, %cst_104 {dimension_numbers = #tpu.dot_dimension_numbers<[1], [0], [0], [1], [0, 0, 1, 1], [], []>} : vector<8x8xf32>, vector<8x256xf32>, vector<8x256xf32> -> vector<8x256xf32>
    %230 = arith.addf %222, %229 : vector<8x256xf32>
    %c0_105 = arith.constant 0 : index
    %c0_106 = arith.constant 0 : index
    %231 = vector.load %arg5[%c0_105, %c0_106] : memref<8x1xf32, #tpu.memory_space<vmem>>, vector<8x1xf32>
    %232 = vector.broadcast %231 : vector<8x1xf32> to vector<8x256xf32>
    %233 = arith.addf %230, %232 : vector<8x256xf32>
    %cst_107 = arith.constant 0.000000e+00 : f32
    %234 = vector.broadcast %cst_107 : f32 to vector<8x256xf32>
    %235 = arith.maximumf %233, %234 : vector<8x256xf32>
    %c240_i32_108 = arith.constant 240 : i32
    %236 = tpu.dynamic_rotate %235 by %c240_i32_108 dim 1 : vector<8x256xf32>, i32 -> vector<8x256xf32>
    %237 = arith.maximumf %235, %236 : vector<8x256xf32>
    %c255_i32_109 = arith.constant 255 : i32
    %238 = tpu.dynamic_rotate %237 by %c255_i32_109 dim 1 : vector<8x256xf32>, i32 -> vector<8x256xf32>
    %239 = arith.maximumf %237, %238 : vector<8x256xf32>
    %c0_110 = arith.constant 0 : index
    %c0_111 = arith.constant 0 : index
    %240 = vector.load %arg10[%c0_110, %c0_111] : memref<256x64xf32, #tpu.memory_space<vmem>>, vector<256x64xf32>
    %cst_112 = arith.constant dense<0.000000e+00> : vector<8x64xf32>
    %241 = tpu.matmul %239, %240, %cst_112 {dimension_numbers = #tpu.dot_dimension_numbers<[1], [0], [0], [1], [0, 0, 1, 1], [], []>} : vector<8x256xf32>, vector<256x64xf32>, vector<8x64xf32> -> vector<8x64xf32>
    %242 = tpu.iota {dimensions = array<i32: 1>} : vector<1x64xi32>
    %c64_i32 = arith.constant 64 : i32
    %c0_i32_113 = arith.constant 0 : i32
    %243 = arith.cmpi eq, %c64_i32, %c0_i32_113 : i32
    %c1_i32_114 = arith.constant 1 : i32
    %244 = arith.select %243, %c1_i32_114, %c64_i32 : i32
    %245 = vector.broadcast %244 : i32 to vector<1x64xi32>
    %246 = arith.remsi %242, %245 : vector<1x64xi32>
    %c0_i32_115 = arith.constant 0 : i32
    %247 = vector.broadcast %c0_i32_115 : i32 to vector<1x64xi32>
    %248 = arith.cmpi ne, %246, %247 : vector<1x64xi32>
    %c0_i32_116 = arith.constant 0 : i32
    %249 = vector.broadcast %c0_i32_116 : i32 to vector<1x64xi32>
    %250 = arith.cmpi slt, %246, %249 : vector<1x64xi32>
    %c0_i32_117 = arith.constant 0 : i32
    %251 = arith.cmpi slt, %244, %c0_i32_117 : i32
    %252 = vector.broadcast %251 : i1 to vector<1x64xi1>
    %253 = vector.broadcast %252 : vector<1x64xi1> to vector<1x64xi1>
    %254 = arith.xori %250, %253 : vector<1x64xi1>
    %255 = arith.andi %254, %248 : vector<1x64xi1>
    %256 = vector.broadcast %244 : i32 to vector<1x64xi32>
    %257 = arith.addi %246, %256 : vector<1x64xi32>
    %258 = arith.select %255, %257, %246 : vector<1x64xi1>, vector<1x64xi32>
    %c8_i32 = arith.constant 8 : i32
    %c0_i32_118 = arith.constant 0 : i32
    %259 = arith.cmpi eq, %c8_i32, %c0_i32_118 : i32
    %c1_i32_119 = arith.constant 1 : i32
    %260 = arith.select %259, %c1_i32_119, %c8_i32 : i32
    %261 = vector.broadcast %260 : i32 to vector<1x64xi32>
    %262 = arith.remsi %258, %261 : vector<1x64xi32>
    %c0_i32_120 = arith.constant 0 : i32
    %263 = vector.broadcast %c0_i32_120 : i32 to vector<1x64xi32>
    %264 = arith.cmpi ne, %262, %263 : vector<1x64xi32>
    %c0_i32_121 = arith.constant 0 : i32
    %265 = vector.broadcast %c0_i32_121 : i32 to vector<1x64xi32>
    %266 = arith.cmpi slt, %262, %265 : vector<1x64xi32>
    %c0_i32_122 = arith.constant 0 : i32
    %267 = arith.cmpi slt, %260, %c0_i32_122 : i32
    %268 = vector.broadcast %267 : i1 to vector<1x64xi1>
    %269 = vector.broadcast %268 : vector<1x64xi1> to vector<1x64xi1>
    %270 = arith.xori %266, %269 : vector<1x64xi1>
    %271 = arith.andi %270, %264 : vector<1x64xi1>
    %272 = vector.broadcast %260 : i32 to vector<1x64xi32>
    %273 = arith.addi %262, %272 : vector<1x64xi32>
    %274 = arith.select %271, %273, %262 : vector<1x64xi1>, vector<1x64xi32>
    %c8_i32_123 = arith.constant 8 : i32
    %275 = vector.broadcast %c8_i32_123 : i32 to vector<1x64xi32>
    %276 = arith.cmpi sge, %258, %275 : vector<1x64xi32>
    %277 = arith.extui %276 : vector<1x64xi1> to vector<1x64xi32>
    %278 = arith.sitofp %277 : vector<1x64xi32> to vector<1x64xf32>
    %c56_i32 = arith.constant 56 : i32
    %279 = vector.broadcast %c56_i32 : i32 to vector<1x64xi32>
    %280 = arith.cmpi slt, %258, %279 : vector<1x64xi32>
    %281 = arith.extui %280 : vector<1x64xi1> to vector<1x64xi32>
    %282 = arith.sitofp %281 : vector<1x64xi32> to vector<1x64xf32>
    %c1_i32_124 = arith.constant 1 : i32
    %283 = vector.broadcast %c1_i32_124 : i32 to vector<1x64xi32>
    %284 = arith.cmpi sge, %274, %283 : vector<1x64xi32>
    %285 = arith.extui %284 : vector<1x64xi1> to vector<1x64xi32>
    %286 = arith.sitofp %285 : vector<1x64xi32> to vector<1x64xf32>
    %c6_i32 = arith.constant 6 : i32
    %287 = vector.broadcast %c6_i32 : i32 to vector<1x64xi32>
    %288 = arith.cmpi sle, %274, %287 : vector<1x64xi32>
    %289 = arith.extui %288 : vector<1x64xi1> to vector<1x64xi32>
    %290 = arith.sitofp %289 : vector<1x64xi32> to vector<1x64xf32>
    %c9_i32 = arith.constant 9 : i32
    %291 = tpu.dynamic_rotate %241 by %c9_i32 dim 1 : vector<8x64xf32>, i32 -> vector<8x64xf32>
    %292 = arith.mulf %278, %286 : vector<1x64xf32>
    %293 = vector.broadcast %292 : vector<1x64xf32> to vector<8x64xf32>
    %294 = arith.mulf %291, %293 : vector<8x64xf32>
    %c0_125 = arith.constant 0 : index
    %c0_126 = arith.constant 0 : index
    %c0_127 = arith.constant 0 : index
    %295 = vector.load %arg6[%c0_125, %c0_126, %c0_127] : memref<9x16x8xf32, #tpu.memory_space<vmem>>, vector<1x16x8xf32>
    %296 = vector.shape_cast %295 : vector<1x16x8xf32> to vector<16x8xf32>
    %cst_128 = arith.constant dense<0.000000e+00> : vector<16x64xf32>
    %297 = tpu.matmul %296, %294, %cst_128 {dimension_numbers = #tpu.dot_dimension_numbers<[1], [0], [0], [1], [0, 0, 1, 1], [], []>} : vector<16x8xf32>, vector<8x64xf32>, vector<16x64xf32> -> vector<16x64xf32>
    %c8_i32_129 = arith.constant 8 : i32
    %298 = tpu.dynamic_rotate %241 by %c8_i32_129 dim 1 : vector<8x64xf32>, i32 -> vector<8x64xf32>
    %299 = vector.broadcast %278 : vector<1x64xf32> to vector<8x64xf32>
    %300 = arith.mulf %298, %299 : vector<8x64xf32>
    %c1_130 = arith.constant 1 : index
    %c0_131 = arith.constant 0 : index
    %c0_132 = arith.constant 0 : index
    %301 = vector.load %arg6[%c1_130, %c0_131, %c0_132] : memref<9x16x8xf32, #tpu.memory_space<vmem>>, vector<1x16x8xf32>
    %302 = vector.shape_cast %301 : vector<1x16x8xf32> to vector<16x8xf32>
    %cst_133 = arith.constant dense<0.000000e+00> : vector<16x64xf32>
    %303 = tpu.matmul %302, %300, %cst_133 {dimension_numbers = #tpu.dot_dimension_numbers<[1], [0], [0], [1], [0, 0, 1, 1], [], []>} : vector<16x8xf32>, vector<8x64xf32>, vector<16x64xf32> -> vector<16x64xf32>
    %304 = arith.addf %297, %303 : vector<16x64xf32>
    %c7_i32 = arith.constant 7 : i32
    %305 = tpu.dynamic_rotate %241 by %c7_i32 dim 1 : vector<8x64xf32>, i32 -> vector<8x64xf32>
    %306 = arith.mulf %278, %290 : vector<1x64xf32>
    %307 = vector.broadcast %306 : vector<1x64xf32> to vector<8x64xf32>
    %308 = arith.mulf %305, %307 : vector<8x64xf32>
    %c2_134 = arith.constant 2 : index
    %c0_135 = arith.constant 0 : index
    %c0_136 = arith.constant 0 : index
    %309 = vector.load %arg6[%c2_134, %c0_135, %c0_136] : memref<9x16x8xf32, #tpu.memory_space<vmem>>, vector<1x16x8xf32>
    %310 = vector.shape_cast %309 : vector<1x16x8xf32> to vector<16x8xf32>
    %cst_137 = arith.constant dense<0.000000e+00> : vector<16x64xf32>
    %311 = tpu.matmul %310, %308, %cst_137 {dimension_numbers = #tpu.dot_dimension_numbers<[1], [0], [0], [1], [0, 0, 1, 1], [], []>} : vector<16x8xf32>, vector<8x64xf32>, vector<16x64xf32> -> vector<16x64xf32>
    %312 = arith.addf %304, %311 : vector<16x64xf32>
    %c1_i32_138 = arith.constant 1 : i32
    %313 = tpu.dynamic_rotate %241 by %c1_i32_138 dim 1 : vector<8x64xf32>, i32 -> vector<8x64xf32>
    %314 = vector.broadcast %286 : vector<1x64xf32> to vector<8x64xf32>
    %315 = arith.mulf %313, %314 : vector<8x64xf32>
    %c3_139 = arith.constant 3 : index
    %c0_140 = arith.constant 0 : index
    %c0_141 = arith.constant 0 : index
    %316 = vector.load %arg6[%c3_139, %c0_140, %c0_141] : memref<9x16x8xf32, #tpu.memory_space<vmem>>, vector<1x16x8xf32>
    %317 = vector.shape_cast %316 : vector<1x16x8xf32> to vector<16x8xf32>
    %cst_142 = arith.constant dense<0.000000e+00> : vector<16x64xf32>
    %318 = tpu.matmul %317, %315, %cst_142 {dimension_numbers = #tpu.dot_dimension_numbers<[1], [0], [0], [1], [0, 0, 1, 1], [], []>} : vector<16x8xf32>, vector<8x64xf32>, vector<16x64xf32> -> vector<16x64xf32>
    %319 = arith.addf %312, %318 : vector<16x64xf32>
    %c4_143 = arith.constant 4 : index
    %c0_144 = arith.constant 0 : index
    %c0_145 = arith.constant 0 : index
    %320 = vector.load %arg6[%c4_143, %c0_144, %c0_145] : memref<9x16x8xf32, #tpu.memory_space<vmem>>, vector<1x16x8xf32>
    %321 = vector.shape_cast %320 : vector<1x16x8xf32> to vector<16x8xf32>
    %cst_146 = arith.constant dense<0.000000e+00> : vector<16x64xf32>
    %322 = tpu.matmul %321, %241, %cst_146 {dimension_numbers = #tpu.dot_dimension_numbers<[1], [0], [0], [1], [0, 0, 1, 1], [], []>} : vector<16x8xf32>, vector<8x64xf32>, vector<16x64xf32> -> vector<16x64xf32>
    %323 = arith.addf %319, %322 : vector<16x64xf32>
    %c63_i32 = arith.constant 63 : i32
    %324 = tpu.dynamic_rotate %241 by %c63_i32 dim 1 : vector<8x64xf32>, i32 -> vector<8x64xf32>
    %325 = vector.broadcast %290 : vector<1x64xf32> to vector<8x64xf32>
    %326 = arith.mulf %324, %325 : vector<8x64xf32>
    %c5_147 = arith.constant 5 : index
    %c0_148 = arith.constant 0 : index
    %c0_149 = arith.constant 0 : index
    %327 = vector.load %arg6[%c5_147, %c0_148, %c0_149] : memref<9x16x8xf32, #tpu.memory_space<vmem>>, vector<1x16x8xf32>
    %328 = vector.shape_cast %327 : vector<1x16x8xf32> to vector<16x8xf32>
    %cst_150 = arith.constant dense<0.000000e+00> : vector<16x64xf32>
    %329 = tpu.matmul %328, %326, %cst_150 {dimension_numbers = #tpu.dot_dimension_numbers<[1], [0], [0], [1], [0, 0, 1, 1], [], []>} : vector<16x8xf32>, vector<8x64xf32>, vector<16x64xf32> -> vector<16x64xf32>
    %330 = arith.addf %323, %329 : vector<16x64xf32>
    %c57_i32 = arith.constant 57 : i32
    %331 = tpu.dynamic_rotate %241 by %c57_i32 dim 1 : vector<8x64xf32>, i32 -> vector<8x64xf32>
    %332 = arith.mulf %282, %286 : vector<1x64xf32>
    %333 = vector.broadcast %332 : vector<1x64xf32> to vector<8x64xf32>
    %334 = arith.mulf %331, %333 : vector<8x64xf32>
    %c6_151 = arith.constant 6 : index
    %c0_152 = arith.constant 0 : index
    %c0_153 = arith.constant 0 : index
    %335 = vector.load %arg6[%c6_151, %c0_152, %c0_153] : memref<9x16x8xf32, #tpu.memory_space<vmem>>, vector<1x16x8xf32>
    %336 = vector.shape_cast %335 : vector<1x16x8xf32> to vector<16x8xf32>
    %cst_154 = arith.constant dense<0.000000e+00> : vector<16x64xf32>
    %337 = tpu.matmul %336, %334, %cst_154 {dimension_numbers = #tpu.dot_dimension_numbers<[1], [0], [0], [1], [0, 0, 1, 1], [], []>} : vector<16x8xf32>, vector<8x64xf32>, vector<16x64xf32> -> vector<16x64xf32>
    %338 = arith.addf %330, %337 : vector<16x64xf32>
    %c56_i32_155 = arith.constant 56 : i32
    %339 = tpu.dynamic_rotate %241 by %c56_i32_155 dim 1 : vector<8x64xf32>, i32 -> vector<8x64xf32>
    %340 = vector.broadcast %282 : vector<1x64xf32> to vector<8x64xf32>
    %341 = arith.mulf %339, %340 : vector<8x64xf32>
    %c7_156 = arith.constant 7 : index
    %c0_157 = arith.constant 0 : index
    %c0_158 = arith.constant 0 : index
    %342 = vector.load %arg6[%c7_156, %c0_157, %c0_158] : memref<9x16x8xf32, #tpu.memory_space<vmem>>, vector<1x16x8xf32>
    %343 = vector.shape_cast %342 : vector<1x16x8xf32> to vector<16x8xf32>
    %cst_159 = arith.constant dense<0.000000e+00> : vector<16x64xf32>
    %344 = tpu.matmul %343, %341, %cst_159 {dimension_numbers = #tpu.dot_dimension_numbers<[1], [0], [0], [1], [0, 0, 1, 1], [], []>} : vector<16x8xf32>, vector<8x64xf32>, vector<16x64xf32> -> vector<16x64xf32>
    %345 = arith.addf %338, %344 : vector<16x64xf32>
    %c55_i32 = arith.constant 55 : i32
    %346 = tpu.dynamic_rotate %241 by %c55_i32 dim 1 : vector<8x64xf32>, i32 -> vector<8x64xf32>
    %347 = arith.mulf %282, %290 : vector<1x64xf32>
    %348 = vector.broadcast %347 : vector<1x64xf32> to vector<8x64xf32>
    %349 = arith.mulf %346, %348 : vector<8x64xf32>
    %c8_160 = arith.constant 8 : index
    %c0_161 = arith.constant 0 : index
    %c0_162 = arith.constant 0 : index
    %350 = vector.load %arg6[%c8_160, %c0_161, %c0_162] : memref<9x16x8xf32, #tpu.memory_space<vmem>>, vector<1x16x8xf32>
    %351 = vector.shape_cast %350 : vector<1x16x8xf32> to vector<16x8xf32>
    %cst_163 = arith.constant dense<0.000000e+00> : vector<16x64xf32>
    %352 = tpu.matmul %351, %349, %cst_163 {dimension_numbers = #tpu.dot_dimension_numbers<[1], [0], [0], [1], [0, 0, 1, 1], [], []>} : vector<16x8xf32>, vector<8x64xf32>, vector<16x64xf32> -> vector<16x64xf32>
    %353 = arith.addf %345, %352 : vector<16x64xf32>
    %c0_164 = arith.constant 0 : index
    %c0_165 = arith.constant 0 : index
    %354 = vector.load %arg7[%c0_164, %c0_165] : memref<16x1xf32, #tpu.memory_space<vmem>>, vector<16x1xf32>
    %355 = vector.broadcast %354 : vector<16x1xf32> to vector<16x64xf32>
    %356 = arith.addf %353, %355 : vector<16x64xf32>
    %cst_166 = arith.constant 0.000000e+00 : f32
    %357 = vector.broadcast %cst_166 : f32 to vector<16x64xf32>
    %358 = arith.maximumf %356, %357 : vector<16x64xf32>
    %359 = tpu.iota {dimensions = array<i32: 1>} : vector<1x64xi32>
    %c64_i32_167 = arith.constant 64 : i32
    %c0_i32_168 = arith.constant 0 : i32
    %360 = arith.cmpi eq, %c64_i32_167, %c0_i32_168 : i32
    %c1_i32_169 = arith.constant 1 : i32
    %361 = arith.select %360, %c1_i32_169, %c64_i32_167 : i32
    %362 = vector.broadcast %361 : i32 to vector<1x64xi32>
    %363 = arith.remsi %359, %362 : vector<1x64xi32>
    %c0_i32_170 = arith.constant 0 : i32
    %364 = vector.broadcast %c0_i32_170 : i32 to vector<1x64xi32>
    %365 = arith.cmpi ne, %363, %364 : vector<1x64xi32>
    %c0_i32_171 = arith.constant 0 : i32
    %366 = vector.broadcast %c0_i32_171 : i32 to vector<1x64xi32>
    %367 = arith.cmpi slt, %363, %366 : vector<1x64xi32>
    %c0_i32_172 = arith.constant 0 : i32
    %368 = arith.cmpi slt, %361, %c0_i32_172 : i32
    %369 = vector.broadcast %368 : i1 to vector<1x64xi1>
    %370 = vector.broadcast %369 : vector<1x64xi1> to vector<1x64xi1>
    %371 = arith.xori %367, %370 : vector<1x64xi1>
    %372 = arith.andi %371, %365 : vector<1x64xi1>
    %373 = vector.broadcast %361 : i32 to vector<1x64xi32>
    %374 = arith.addi %363, %373 : vector<1x64xi32>
    %375 = arith.select %372, %374, %363 : vector<1x64xi1>, vector<1x64xi32>
    %c8_i32_173 = arith.constant 8 : i32
    %c0_i32_174 = arith.constant 0 : i32
    %376 = arith.cmpi eq, %c8_i32_173, %c0_i32_174 : i32
    %c1_i32_175 = arith.constant 1 : i32
    %377 = arith.select %376, %c1_i32_175, %c8_i32_173 : i32
    %378 = vector.broadcast %377 : i32 to vector<1x64xi32>
    %379 = arith.remsi %375, %378 : vector<1x64xi32>
    %c0_i32_176 = arith.constant 0 : i32
    %380 = vector.broadcast %c0_i32_176 : i32 to vector<1x64xi32>
    %381 = arith.cmpi ne, %379, %380 : vector<1x64xi32>
    %c0_i32_177 = arith.constant 0 : i32
    %382 = vector.broadcast %c0_i32_177 : i32 to vector<1x64xi32>
    %383 = arith.cmpi slt, %379, %382 : vector<1x64xi32>
    %c0_i32_178 = arith.constant 0 : i32
    %384 = arith.cmpi slt, %377, %c0_i32_178 : i32
    %385 = vector.broadcast %384 : i1 to vector<1x64xi1>
    %386 = vector.broadcast %385 : vector<1x64xi1> to vector<1x64xi1>
    %387 = arith.xori %383, %386 : vector<1x64xi1>
    %388 = arith.andi %387, %381 : vector<1x64xi1>
    %389 = vector.broadcast %377 : i32 to vector<1x64xi32>
    %390 = arith.addi %379, %389 : vector<1x64xi32>
    %391 = arith.select %388, %390, %379 : vector<1x64xi1>, vector<1x64xi32>
    %c8_i32_179 = arith.constant 8 : i32
    %392 = vector.broadcast %c8_i32_179 : i32 to vector<1x64xi32>
    %393 = arith.cmpi sge, %375, %392 : vector<1x64xi32>
    %394 = arith.extui %393 : vector<1x64xi1> to vector<1x64xi32>
    %395 = arith.sitofp %394 : vector<1x64xi32> to vector<1x64xf32>
    %c56_i32_180 = arith.constant 56 : i32
    %396 = vector.broadcast %c56_i32_180 : i32 to vector<1x64xi32>
    %397 = arith.cmpi slt, %375, %396 : vector<1x64xi32>
    %398 = arith.extui %397 : vector<1x64xi1> to vector<1x64xi32>
    %399 = arith.sitofp %398 : vector<1x64xi32> to vector<1x64xf32>
    %c1_i32_181 = arith.constant 1 : i32
    %400 = vector.broadcast %c1_i32_181 : i32 to vector<1x64xi32>
    %401 = arith.cmpi sge, %391, %400 : vector<1x64xi32>
    %402 = arith.extui %401 : vector<1x64xi1> to vector<1x64xi32>
    %403 = arith.sitofp %402 : vector<1x64xi32> to vector<1x64xf32>
    %c6_i32_182 = arith.constant 6 : i32
    %404 = vector.broadcast %c6_i32_182 : i32 to vector<1x64xi32>
    %405 = arith.cmpi sle, %391, %404 : vector<1x64xi32>
    %406 = arith.extui %405 : vector<1x64xi1> to vector<1x64xi32>
    %407 = arith.sitofp %406 : vector<1x64xi32> to vector<1x64xf32>
    %c9_i32_183 = arith.constant 9 : i32
    %408 = tpu.dynamic_rotate %358 by %c9_i32_183 dim 1 : vector<16x64xf32>, i32 -> vector<16x64xf32>
    %409 = arith.mulf %395, %403 : vector<1x64xf32>
    %410 = vector.broadcast %409 : vector<1x64xf32> to vector<16x64xf32>
    %411 = arith.mulf %408, %410 : vector<16x64xf32>
    %c0_184 = arith.constant 0 : index
    %c0_185 = arith.constant 0 : index
    %c0_186 = arith.constant 0 : index
    %412 = vector.load %arg8[%c0_184, %c0_185, %c0_186] : memref<9x16x16xf32, #tpu.memory_space<vmem>>, vector<1x16x16xf32>
    %413 = vector.shape_cast %412 : vector<1x16x16xf32> to vector<16x16xf32>
    %cst_187 = arith.constant dense<0.000000e+00> : vector<16x64xf32>
    %414 = tpu.matmul %413, %411, %cst_187 {dimension_numbers = #tpu.dot_dimension_numbers<[1], [0], [0], [1], [0, 0, 1, 1], [], []>} : vector<16x16xf32>, vector<16x64xf32>, vector<16x64xf32> -> vector<16x64xf32>
    %c8_i32_188 = arith.constant 8 : i32
    %415 = tpu.dynamic_rotate %358 by %c8_i32_188 dim 1 : vector<16x64xf32>, i32 -> vector<16x64xf32>
    %416 = vector.broadcast %395 : vector<1x64xf32> to vector<16x64xf32>
    %417 = arith.mulf %415, %416 : vector<16x64xf32>
    %c1_189 = arith.constant 1 : index
    %c0_190 = arith.constant 0 : index
    %c0_191 = arith.constant 0 : index
    %418 = vector.load %arg8[%c1_189, %c0_190, %c0_191] : memref<9x16x16xf32, #tpu.memory_space<vmem>>, vector<1x16x16xf32>
    %419 = vector.shape_cast %418 : vector<1x16x16xf32> to vector<16x16xf32>
    %cst_192 = arith.constant dense<0.000000e+00> : vector<16x64xf32>
    %420 = tpu.matmul %419, %417, %cst_192 {dimension_numbers = #tpu.dot_dimension_numbers<[1], [0], [0], [1], [0, 0, 1, 1], [], []>} : vector<16x16xf32>, vector<16x64xf32>, vector<16x64xf32> -> vector<16x64xf32>
    %421 = arith.addf %414, %420 : vector<16x64xf32>
    %c7_i32_193 = arith.constant 7 : i32
    %422 = tpu.dynamic_rotate %358 by %c7_i32_193 dim 1 : vector<16x64xf32>, i32 -> vector<16x64xf32>
    %423 = arith.mulf %395, %407 : vector<1x64xf32>
    %424 = vector.broadcast %423 : vector<1x64xf32> to vector<16x64xf32>
    %425 = arith.mulf %422, %424 : vector<16x64xf32>
    %c2_194 = arith.constant 2 : index
    %c0_195 = arith.constant 0 : index
    %c0_196 = arith.constant 0 : index
    %426 = vector.load %arg8[%c2_194, %c0_195, %c0_196] : memref<9x16x16xf32, #tpu.memory_space<vmem>>, vector<1x16x16xf32>
    %427 = vector.shape_cast %426 : vector<1x16x16xf32> to vector<16x16xf32>
    %cst_197 = arith.constant dense<0.000000e+00> : vector<16x64xf32>
    %428 = tpu.matmul %427, %425, %cst_197 {dimension_numbers = #tpu.dot_dimension_numbers<[1], [0], [0], [1], [0, 0, 1, 1], [], []>} : vector<16x16xf32>, vector<16x64xf32>, vector<16x64xf32> -> vector<16x64xf32>
    %429 = arith.addf %421, %428 : vector<16x64xf32>
    %c1_i32_198 = arith.constant 1 : i32
    %430 = tpu.dynamic_rotate %358 by %c1_i32_198 dim 1 : vector<16x64xf32>, i32 -> vector<16x64xf32>
    %431 = vector.broadcast %403 : vector<1x64xf32> to vector<16x64xf32>
    %432 = arith.mulf %430, %431 : vector<16x64xf32>
    %c3_199 = arith.constant 3 : index
    %c0_200 = arith.constant 0 : index
    %c0_201 = arith.constant 0 : index
    %433 = vector.load %arg8[%c3_199, %c0_200, %c0_201] : memref<9x16x16xf32, #tpu.memory_space<vmem>>, vector<1x16x16xf32>
    %434 = vector.shape_cast %433 : vector<1x16x16xf32> to vector<16x16xf32>
    %cst_202 = arith.constant dense<0.000000e+00> : vector<16x64xf32>
    %435 = tpu.matmul %434, %432, %cst_202 {dimension_numbers = #tpu.dot_dimension_numbers<[1], [0], [0], [1], [0, 0, 1, 1], [], []>} : vector<16x16xf32>, vector<16x64xf32>, vector<16x64xf32> -> vector<16x64xf32>
    %436 = arith.addf %429, %435 : vector<16x64xf32>
    %c4_203 = arith.constant 4 : index
    %c0_204 = arith.constant 0 : index
    %c0_205 = arith.constant 0 : index
    %437 = vector.load %arg8[%c4_203, %c0_204, %c0_205] : memref<9x16x16xf32, #tpu.memory_space<vmem>>, vector<1x16x16xf32>
    %438 = vector.shape_cast %437 : vector<1x16x16xf32> to vector<16x16xf32>
    %cst_206 = arith.constant dense<0.000000e+00> : vector<16x64xf32>
    %439 = tpu.matmul %438, %358, %cst_206 {dimension_numbers = #tpu.dot_dimension_numbers<[1], [0], [0], [1], [0, 0, 1, 1], [], []>} : vector<16x16xf32>, vector<16x64xf32>, vector<16x64xf32> -> vector<16x64xf32>
    %440 = arith.addf %436, %439 : vector<16x64xf32>
    %c63_i32_207 = arith.constant 63 : i32
    %441 = tpu.dynamic_rotate %358 by %c63_i32_207 dim 1 : vector<16x64xf32>, i32 -> vector<16x64xf32>
    %442 = vector.broadcast %407 : vector<1x64xf32> to vector<16x64xf32>
    %443 = arith.mulf %441, %442 : vector<16x64xf32>
    %c5_208 = arith.constant 5 : index
    %c0_209 = arith.constant 0 : index
    %c0_210 = arith.constant 0 : index
    %444 = vector.load %arg8[%c5_208, %c0_209, %c0_210] : memref<9x16x16xf32, #tpu.memory_space<vmem>>, vector<1x16x16xf32>
    %445 = vector.shape_cast %444 : vector<1x16x16xf32> to vector<16x16xf32>
    %cst_211 = arith.constant dense<0.000000e+00> : vector<16x64xf32>
    %446 = tpu.matmul %445, %443, %cst_211 {dimension_numbers = #tpu.dot_dimension_numbers<[1], [0], [0], [1], [0, 0, 1, 1], [], []>} : vector<16x16xf32>, vector<16x64xf32>, vector<16x64xf32> -> vector<16x64xf32>
    %447 = arith.addf %440, %446 : vector<16x64xf32>
    %c57_i32_212 = arith.constant 57 : i32
    %448 = tpu.dynamic_rotate %358 by %c57_i32_212 dim 1 : vector<16x64xf32>, i32 -> vector<16x64xf32>
    %449 = arith.mulf %399, %403 : vector<1x64xf32>
    %450 = vector.broadcast %449 : vector<1x64xf32> to vector<16x64xf32>
    %451 = arith.mulf %448, %450 : vector<16x64xf32>
    %c6_213 = arith.constant 6 : index
    %c0_214 = arith.constant 0 : index
    %c0_215 = arith.constant 0 : index
    %452 = vector.load %arg8[%c6_213, %c0_214, %c0_215] : memref<9x16x16xf32, #tpu.memory_space<vmem>>, vector<1x16x16xf32>
    %453 = vector.shape_cast %452 : vector<1x16x16xf32> to vector<16x16xf32>
    %cst_216 = arith.constant dense<0.000000e+00> : vector<16x64xf32>
    %454 = tpu.matmul %453, %451, %cst_216 {dimension_numbers = #tpu.dot_dimension_numbers<[1], [0], [0], [1], [0, 0, 1, 1], [], []>} : vector<16x16xf32>, vector<16x64xf32>, vector<16x64xf32> -> vector<16x64xf32>
    %455 = arith.addf %447, %454 : vector<16x64xf32>
    %c56_i32_217 = arith.constant 56 : i32
    %456 = tpu.dynamic_rotate %358 by %c56_i32_217 dim 1 : vector<16x64xf32>, i32 -> vector<16x64xf32>
    %457 = vector.broadcast %399 : vector<1x64xf32> to vector<16x64xf32>
    %458 = arith.mulf %456, %457 : vector<16x64xf32>
    %c7_218 = arith.constant 7 : index
    %c0_219 = arith.constant 0 : index
    %c0_220 = arith.constant 0 : index
    %459 = vector.load %arg8[%c7_218, %c0_219, %c0_220] : memref<9x16x16xf32, #tpu.memory_space<vmem>>, vector<1x16x16xf32>
    %460 = vector.shape_cast %459 : vector<1x16x16xf32> to vector<16x16xf32>
    %cst_221 = arith.constant dense<0.000000e+00> : vector<16x64xf32>
    %461 = tpu.matmul %460, %458, %cst_221 {dimension_numbers = #tpu.dot_dimension_numbers<[1], [0], [0], [1], [0, 0, 1, 1], [], []>} : vector<16x16xf32>, vector<16x64xf32>, vector<16x64xf32> -> vector<16x64xf32>
    %462 = arith.addf %455, %461 : vector<16x64xf32>
    %c55_i32_222 = arith.constant 55 : i32
    %463 = tpu.dynamic_rotate %358 by %c55_i32_222 dim 1 : vector<16x64xf32>, i32 -> vector<16x64xf32>
    %464 = arith.mulf %399, %407 : vector<1x64xf32>
    %465 = vector.broadcast %464 : vector<1x64xf32> to vector<16x64xf32>
    %466 = arith.mulf %463, %465 : vector<16x64xf32>
    %c8_223 = arith.constant 8 : index
    %c0_224 = arith.constant 0 : index
    %c0_225 = arith.constant 0 : index
    %467 = vector.load %arg8[%c8_223, %c0_224, %c0_225] : memref<9x16x16xf32, #tpu.memory_space<vmem>>, vector<1x16x16xf32>
    %468 = vector.shape_cast %467 : vector<1x16x16xf32> to vector<16x16xf32>
    %cst_226 = arith.constant dense<0.000000e+00> : vector<16x64xf32>
    %469 = tpu.matmul %468, %466, %cst_226 {dimension_numbers = #tpu.dot_dimension_numbers<[1], [0], [0], [1], [0, 0, 1, 1], [], []>} : vector<16x16xf32>, vector<16x64xf32>, vector<16x64xf32> -> vector<16x64xf32>
    %470 = arith.addf %462, %469 : vector<16x64xf32>
    %c0_227 = arith.constant 0 : index
    %c0_228 = arith.constant 0 : index
    %471 = vector.load %arg9[%c0_227, %c0_228] : memref<16x1xf32, #tpu.memory_space<vmem>>, vector<16x1xf32>
    %472 = vector.broadcast %471 : vector<16x1xf32> to vector<16x64xf32>
    %473 = arith.addf %470, %472 : vector<16x64xf32>
    %cst_229 = arith.constant 0.000000e+00 : f32
    %474 = vector.broadcast %cst_229 : f32 to vector<16x64xf32>
    %475 = arith.maximumf %473, %474 : vector<16x64xf32>
    %c56_i32_230 = arith.constant 56 : i32
    %476 = tpu.dynamic_rotate %475 by %c56_i32_230 dim 1 : vector<16x64xf32>, i32 -> vector<16x64xf32>
    %477 = arith.maximumf %475, %476 : vector<16x64xf32>
    %c63_i32_231 = arith.constant 63 : i32
    %478 = tpu.dynamic_rotate %477 by %c63_i32_231 dim 1 : vector<16x64xf32>, i32 -> vector<16x64xf32>
    %479 = arith.maximumf %477, %478 : vector<16x64xf32>
    %c0_232 = arith.constant 0 : index
    %c0_233 = arith.constant 0 : index
    %480 = vector.load %arg11[%c0_232, %c0_233] : memref<64x16xf32, #tpu.memory_space<vmem>>, vector<64x16xf32>
    %cst_234 = arith.constant dense<0.000000e+00> : vector<16x16xf32>
    %481 = tpu.matmul %479, %480, %cst_234 {dimension_numbers = #tpu.dot_dimension_numbers<[1], [0], [0], [1], [0, 0, 1, 1], [], []>} : vector<16x64xf32>, vector<64x16xf32>, vector<16x16xf32> -> vector<16x16xf32>
    %c0_235 = arith.constant 0 : index
    %c0_236 = arith.constant 0 : index
    %c0_237 = arith.constant 0 : index
    %482 = vector.load %arg12[%c0_235, %c0_236, %c0_237] : memref<1x16x16xf32, #tpu.memory_space<vmem>>, vector<1x16x16xf32>
    %483 = vector.shape_cast %482 : vector<1x16x16xf32> to vector<16x16xf32>
    %484 = vector.shape_cast %481 : vector<16x16xf32> to vector<1x16x16xf32>
    tpu.vector_store %arg12[%c0_235, %c0_236, %c0_237], %484 {strides = array<i32>} : memref<1x16x16xf32, #tpu.memory_space<vmem>>, vector<1x16x16xf32>,
    return
  }
  func.func @transform_0(%arg0: i32) -> (i32, i32, i32) {
    %c0_i32 = arith.constant 0 : i32
    %c0_i32_0 = arith.constant 0 : i32
    %c0_i32_1 = arith.constant 0 : i32
    return %arg0, %c0_i32, %c0_i32_0 : i32, i32, i32
  }
  func.func @transform_1(%arg0: i32) -> (i32, i32, i32) {
    %c0_i32 = arith.constant 0 : i32
    %c0_i32_0 = arith.constant 0 : i32
    %c0_i32_1 = arith.constant 0 : i32
    %c0_i32_2 = arith.constant 0 : i32
    return %c0_i32, %c0_i32_0, %c0_i32_1 : i32, i32, i32
  }
  func.func @transform_2(%arg0: i32) -> (i32, i32) {
    %c0_i32 = arith.constant 0 : i32
    %c0_i32_0 = arith.constant 0 : i32
    %c0_i32_1 = arith.constant 0 : i32
    return %c0_i32, %c0_i32_0 : i32, i32
  }
  func.func @transform_3(%arg0: i32) -> (i32, i32, i32) {
    %c0_i32 = arith.constant 0 : i32
    %c0_i32_0 = arith.constant 0 : i32
    %c0_i32_1 = arith.constant 0 : i32
    %c0_i32_2 = arith.constant 0 : i32
    return %c0_i32, %c0_i32_0, %c0_i32_1 : i32, i32, i32
  }
  func.func @transform_4(%arg0: i32) -> (i32, i32) {
    %c0_i32 = arith.constant 0 : i32
    %c0_i32_0 = arith.constant 0 : i32
    %c0_i32_1 = arith.constant 0 : i32
    return %c0_i32, %c0_i32_0 : i32, i32
  }
  func.func @transform_5(%arg0: i32) -> (i32, i32, i32) {
    %c0_i32 = arith.constant 0 : i32
    %c0_i32_0 = arith.constant 0 : i32
    %c0_i32_1 = arith.constant 0 : i32
    %c0_i32_2 = arith.constant 0 : i32
    return %c0_i32, %c0_i32_0, %c0_i32_1 : i32, i32, i32
  }
  func.func @transform_6(%arg0: i32) -> (i32, i32) {
    %c0_i32 = arith.constant 0 : i32
    %c0_i32_0 = arith.constant 0 : i32
    %c0_i32_1 = arith.constant 0 : i32
    return %c0_i32, %c0_i32_0 : i32, i32
  }
  func.func @transform_7(%arg0: i32) -> (i32, i32, i32) {
    %c0_i32 = arith.constant 0 : i32
    %c0_i32_0 = arith.constant 0 : i32
    %c0_i32_1 = arith.constant 0 : i32
    %c0_i32_2 = arith.constant 0 : i32
    return %c0_i32, %c0_i32_0, %c0_i32_1 : i32, i32, i32
  }
  func.func @transform_8(%arg0: i32) -> (i32, i32) {
    %c0_i32 = arith.constant 0 : i32
    %c0_i32_0 = arith.constant 0 : i32
    %c0_i32_1 = arith.constant 0 : i32
    return %c0_i32, %c0_i32_0 : i32, i32
  }
  func.func @transform_9(%arg0: i32) -> (i32, i32) {
    %c0_i32 = arith.constant 0 : i32
    %c0_i32_0 = arith.constant 0 : i32
    %c0_i32_1 = arith.constant 0 : i32
    return %c0_i32, %c0_i32_0 : i32, i32
  }
  func.func @transform_10(%arg0: i32) -> (i32, i32) {
    %c0_i32 = arith.constant 0 : i32
    %c0_i32_0 = arith.constant 0 : i32
    %c0_i32_1 = arith.constant 0 : i32
    return %c0_i32, %c0_i32_0 : i32, i32
  }
  func.func @transform_11(%arg0: i32) -> (i32, i32, i32) {
    %c0_i32 = arith.constant 0 : i32
    %c0_i32_0 = arith.constant 0 : i32
    %c0_i32_1 = arith.constant 0 : i32
    return %arg0, %c0_i32, %c0_i32_0 : i32, i32, i32
  }
}

</mosaic_0001>

<bundles_post_ra>
// kernel: tpu_custom_call.1
= control target key start
LH: loop header
LB: loop body
LE: loop exit
PB: predicated region body
PF: predicated region fallthrough
CT: control target
= control target key end

     0   :  { %s5826_s0 = inlined_call_operand.vmem [shape: f32[2,4,256], index: 0, kind: input, shape index: {}]   ;;  %s5827_s1 = inlined_call_operand.vmem [shape: f32[9,8,4], index: 1, kind: input, shape index: {}]   ;;  %s5828_s2 = inlined_call_operand.vmem [shape: f32[8,1], index: 2, kind: input, shape index: {}]   ;;  %s5829_s3 = inlined_call_operand.vmem [shape: f32[9,8,8], index: 3, kind: input, shape index: {}]   ;;  %s5830_s4 = inlined_call_operand.vmem [shape: f32[8,1], index: 4, kind: input, shape index: {}]   ;;  %s5831_s5 = inlined_call_operand.vmem [shape: f32[9,16,8], index: 5, kind: input, shape index: {}]   ;;  %s5832_s6 = inlined_call_operand.vmem [shape: f32[16,1], index: 6, kind: input, shape index: {}]   ;;  %s5833_s7 = inlined_call_operand.vmem [shape: f32[9,16,16], index: 7, kind: input, shape index: {}]   ;;  %s5834_s8 = inlined_call_operand.vmem [shape: f32[16,1], index: 8, kind: input, shape index: {}]   ;;  %s5835_s9 = inlined_call_operand.vmem [shape: f32[256,64], index: 9, kind: input, shape index: {}]   ;;  %s5836_s10 = inlined_call_operand.vmem [shape: f32[64,16], index: 10, kind: input, shape index: {}]   ;;  %s5837_s11 = inlined_call_operand.hbm [shape: f32[2,16,16], index: 11, kind: output, shape index: {}]  }
   0x1   :  { %5855 = sst [smem:[#allocation5_spill]] %s5826_s0 }
   0x2   :  { %16 = vsyncpa [#allocation3], 0 }
   0x3   :  { %18 = vsyncpa [#allocation3 + $0x1], 0  ;;  %s4987_s17 = smov 0   ;;  %s4989_s18 = smov 0  }
   0x4   :  { %s4991_s19 = smov 0   ;;  %s4993_s20 = smov 0  }
   0x5 LB: > { %s5008_s21 = sadd.s32 4294967295, %s4898_s20   ;;  %s4189_s22 = sadd.s32 4294967294, %s4898_s20   ;;  %s4898_s20 = sphi %s4993_s20, %s5874_s20   ;;  %s4894_s19 = sphi %s4991_s19, %s5873_s19   ;;  %s4890_s18 = sphi %s4989_s18, %s5872_s18   ;;  %s4886_s17 = sphi %s4987_s17, %s5871_s17  }
   0x6   : > { %s5012_s23 = sadd.s32 1, %s4898_s20   ;;  %s267_s24 = sadd.s32 1, %s4894_s19 }
   0x7   : > { %s264_s25 = ssub.s32 %s4898_s20, %s5012_s23  ;;  %p277_p0 = scmp.ne.s32.totalorder %s4894_s19, %s4890_s18 }
   0x8   : > { %p265_p1 = scmp.eq.s32.totalorder %s264_s25, 0  ;;  %p278_p2 = scmp.eq.s32.totalorder %s5008_s21, 1 }
   0x9   : > { %p283_p3 = scmp.ne.s32.totalorder %s4890_s18, %s4886_s17  ;;  %p284_p4 = scmp.eq.s32.totalorder %s4189_s22, 1 }
   0xa   : > { %s5023_s26 = scalar_select %p265_p1, %s4894_s19, %s267_s24  }
   0xb   : > { %p5025_p5 = por %p278_p2, %p277_p0  ;;  %p5029_p6 = por %p284_p4, %p283_p3 }
   0xc   : > { %p4192_p7 = scmp.ge.s32.totalorder %s4898_s20, 1  ;;  %p340_p8 = scmp.lt.s32.totalorder %s4898_s20, 3 }
   0xe   : > { %p341_p9 = pnand %p4192_p7, %p340_p8 }
   0xf   : > { %p380_p10 = scmp.lt.s32.totalorder (!%p341_p9), %s5008_s21, 1  ;;  %v4900_v0 = vmov (!%p341_p9), 0.0   ;;  %s5858_s0 = sld [smem:[#allocation5_spill]] (!%p341_p9)  ;;  %v1295_v3 = vld [vmem:[%s5828_s2] sm:$0xff] (!%p341_p9)  ;;  %v4909_v4 = vmov (!%p341_p9), 0   ;;  %v386_v5 = vlaneseq (!%p341_p9)  ;;  %vm491_vm7 = vcmask (!%p341_p9), 1043456  }
  0x10   : > { %344 = sbr.rel (%p341_p9) target bundleno = 3481 (0xd99), region = 64  ;;  %735 = vmatprep.mubr.f32.mxu0 (!%p341_p9), %v4900_v0  ;;  %562 = vmatprep.mubr.f32.mxu1 (!%p341_p9), %v4900_v0  ;;  %s4901_s15 = smov (!%p341_p9), 15   ;;  %vm487_vm8 = vcmask (!%p341_p9), 31744   ;;  %v4209_v30 = vld [vmem:[%s5827_s1 + $0x10] sm:$0xff] (!%p341_p9)  ;;  %v4213_v36 = vld [vmem:[%s5827_s1 + $0x18] sm:$0xff] (!%p341_p9)  ;;  %v4202_v49 = vld [vmem:[%s5827_s1 + $0x8] sm:$0xff] (!%p341_p9) }
  0x11   : > { %s5842_s16 = smov (!%p341_p9), 1   ;;  %s5843_s22 = smov (!%p341_p9), 127   ;;  %4783 = vset.pattern.permute.xlu0 (!%p341_p9), %v4909_v4  ;;  %4794 = vset.pattern.permute.xlu1 (!%p341_p9), %v4909_v4  ;;  %v5083_v6 = vand.u32 (!%p341_p9), 127, %v386_v5  ;;  %v4217_v52 = vld [vmem:[%s5827_s1 + $0x20] sm:$0xff] (!%p341_p9) }
  0x12   : > { %s4904_s24 = smov (!%p341_p9), 113   ;;  %s5840_s25 = smov (!%p341_p9), 112   ;;  %v475_v62 = vld [vmem:[%s5827_s1] sm:$0xff] (!%p341_p9) }
  0x13   : > { %s5838_s12 = smov (!%p341_p9), 111   ;;  %v393_v7 = vand.u32 (!%p341_p9), 255, %v5083_v6  ;;  %v388_v8 = vadd.s32 (!%p341_p9), 128, %v5083_v6  ;;  %vm653_vm5 = vcmp.lt.s32.totalorder (!%p341_p9), %v5083_v6, 15  ;;  %vm748_vm6 = vcmp.lt.s32.totalorder (!%p341_p9), %v5083_v6, 1  ;;  %s5859_s13 = smov (!%p341_p9), 112  }
  0x14   : > { %vm923_vm9 = vcmp.lt.s32.totalorder (!%p341_p9), %v5083_v6, 127  ;;  %vm1016_vm11 = vcmp.lt.s32.totalorder (!%p341_p9), %v5083_v6, 113  ;;  %vm480_vm12 = vcmp.lt.s32.totalorder (!%p341_p9), %v5083_v6, 16  ;;  %vm468_vm13 = vcmp.lt.s32.totalorder (!%p341_p9), %v5083_v6, 17 }
  0x15   : > { %v417_v9 = vand.u32 (!%p341_p9), 15, %v393_v7  ;;  %v400_v10 = vand.u32 (!%p341_p9), 255, %v388_v8  ;;  %vm437_vm0 = vcmp.ge.s32.totalorder (!%p341_p9), %v393_v7, 16  ;;  %vm1111_vm14 = vcmp.lt.s32.totalorder (!%p341_p9), %v5083_v6, 112  ;;  %v4225_v8 = vld [vmem:[%s5827_s1 + $0x30] sm:$0xff] (!%p341_p9) }
  0x16   : > { %v5088_v12 = vsel (!%p341_p9), %vm437_vm0, 1.0, %v4900_v0  ;;  %vm1204_vm15 = vcmp.lt.s32.totalorder (!%p341_p9), %v5083_v6, 111  ;;  %vm1324_vm0 = vcmask (!%p341_p9), 64512  }
  0x17   : > { %s381_s29 = scalar_select %p380_p10, %s5008_s21, 1  ;;  %vm455_vm1 = vcmp.le.s32.totalorder %v417_v9, 14  ;;  %v424_v11 = vand.u32 15, %v400_v10  ;;  %vm449_vm4 = vcmp.ge.s32.totalorder %v417_v9, 1  ;;  %vm444_vm10 = vcmp.lt.s32.totalorder %v400_v10, 240 }
  0x18   : > { %v5091_v13 = vsel %vm455_vm1, 1.0, %v4900_v0  ;;  %v5106_v20 = vsel %vm449_vm4, 1.0, %v4900_v0  ;;  %v5139_v40 = vsel %vm444_vm10, 1.0, %v4900_v0 }
  0x19   : > { %s4333_s30 = sshll.u32 %s381_s29, 3  ;;  %s4906_s29 = smov 16   ;;  %vm450_vm2 = vcmp.ge.s32.totalorder %v424_v11, 1  ;;  %vm456_vm3 = vcmp.le.s32.totalorder %v424_v11, 14  ;;  %v5096_v16 = vmul.f32 %v5091_v13, %v5088_v12  ;;  %v5168_v50 = vmul.f32 %v5106_v20, %v5088_v12 }
  0x1a   : > { %s384_s14 = scalar_lea.vmem %s5858_s0, %s4333_s30  ;;  %s4907_s30 = smov 17   ;;  %v5100_v17 = vsel %vm450_vm2, 1.0, %v4900_v0  ;;  %v5103_v18 = vsel %vm456_vm3, 1.0, %v4900_v0 }
  0x1b   : > { %v5042_v1 = vld [vmem:[%s384_s14] sm:$0xff]  ;;  %v5152_v42 = vmul.f32 %v5100_v17, %v5139_v40  ;;  %v5212_v5 = vmul.f32 %v5103_v18, %v5139_v40  ;;  %s4911_s14 = smov 56   ;;  %s4916_s0 = smov 63  }
  0x1c   : > { %649 = vrot.lane.b32.xlu0 %v5042_v1, %s4901_s15  ;;  %744 = vrot.lane.b32.xlu1 %v5042_v1, %s5842_s16  ;;  %v5050_v2 = vcombine.high %v5042_v1, %v5042_v1 }
  0x20   : > { %651 = vrot.lane.b32.xlu0 %v5050_v2, %s4901_s15  ;;  %746 = vrot.lane.b32.xlu1 %v5050_v2, %s5842_s16 }
  0x24   : > { %921 = vrot.lane.b32.xlu1 %v5050_v2, %s5843_s22  ;;  %919 = vrot.lane.b32.xlu0 %v5042_v1, %s5843_s22 }
  0x28   : > { %1014 = vrot.lane.b32.xlu1 %v5050_v2, %s4904_s24  ;;  %1012 = vrot.lane.b32.xlu0 %v5042_v1, %s4904_s24 }
  0x2c   : > { %1109 = vrot.lane.b32.xlu1 %v5050_v2, %s5840_s25  ;;  %1107 = vrot.lane.b32.xlu0 %v5042_v1, %s5840_s25  ;;  %s5845_s25 = smov 8  }
  0x30   : > { %478 = vrot.lane.b32.xlu1 %v5050_v2, %s4906_s29  ;;  %476 = vrot.lane.b32.xlu0 %v5042_v1, %s4906_s29 }
  0x34   : > { %466 = vrot.lane.b32.xlu1 %v5050_v2, %s4907_s30  ;;  %464 = vrot.lane.b32.xlu0 %v5042_v1, %s4907_s30 }
  0x38   : > { %1202 = vrot.lane.b32.xlu1 %v5050_v2, %s5838_s12  ;;  %1200 = vrot.lane.b32.xlu0 %v5042_v1, %s5838_s12  ;;  %s4915_s12 = smov 55  }
  0x3c   : > { %1298 = vperm.xlu0 %4783, %v1295_v3  }
  0x8e   : > { %v650_v14 = vpop.permute.xlu0 %649  ;;  %v745_v15 = vpop.permute.xlu1 %744 }
  0x92   : > { %v652_v19 = vpop.permute.xlu0 %651  ;;  %v747_v21 = vpop.permute.xlu1 %746 }
  0x93   : > { %v654_v22 = vsel %vm653_vm5, %v650_v14, %v652_v19  ;;  %v655_v23 = vsel %vm653_vm5, %v652_v19, %v650_v14  ;;  %v749_v24 = vsel %vm748_vm6, %v745_v15, %v747_v21  ;;  %v750_v25 = vsel %vm748_vm6, %v747_v21, %v745_v15  ;;  %v4229_v15 = vld [vmem:[%s5827_s1 + $0x38] sm:$0xff]  ;;  %v4233_v19 = vld [vmem:[%s5827_s1 + $0x40] sm:$0xff] }
  0x94   : > { %v658_v26 = vmul.f32 %v5096_v16, %v655_v23  ;;  %v752_v27 = vmul.f32 %v5100_v17, %v749_v24  ;;  %v659_v28 = vmul.f32 %v5103_v18, %v654_v22  ;;  %v751_v29 = vmul.f32 %v5106_v20, %v750_v25 }
  0x96   : > { %4210 = vmatprep.subr.msk.mxu0 %vm491_vm7, %v659_v28  ;;  %v922_v31 = vpop.permute.xlu1 %921  ;;  %v920_v32 = vpop.permute.xlu0 %919 }
  0x97   : > { %4211 = vmatpush1.msk.msra.mxu0 %vm491_vm7, %v658_v26  ;;  %v925_v35 = vsel %vm923_vm9, %v922_v31, %v920_v32  ;;  %v924_v41 = vsel %vm923_vm9, %v920_v32, %v922_v31  ;;  %v2067_v32 = vld [vmem:[%s5830_s4] sm:$0xff] }
  0x98   : > { %4212 = vmatmul.mubr.msk.f32.vlgmr.msra.gmra.mrb[0].mxu0 %vm487_vm8, %v4209_v30  ;;  %4214 = vmatprep.subr.msk.mxu0 %vm491_vm7, %v752_v27  ;;  %v927_v37 = vmul.f32 %v5103_v18, %v925_v35  ;;  %v926_v51 = vmul.f32 %v5091_v13, %v924_v41 }
  0x99   : > { %4215 = vmatpush1.msk.msra.mxu0 %vm491_vm7, %v751_v29  ;;  %828 = vmatprep.mubr.f32.mxu0 %v4900_v0 }
  0x9a   : > { %4218 = vmatprep.subr.msk.mxu0 %vm491_vm7, %v5050_v2  ;;  %v1015_v33 = vpop.permute.xlu1 %1014  ;;  %v1013_v34 = vpop.permute.xlu0 %1012 }
  0x9b   : > { %v1018_v45 = vsel %vm1016_vm11, %v1015_v33, %v1013_v34  ;;  %v1017_v60 = vsel %vm1016_vm11, %v1013_v34, %v1015_v33 }
  0x9c   : > { %v1022_v53 = vmul.f32 %v5152_v42, %v1018_v45  ;;  %v1021_v63 = vmul.f32 %v5106_v20, %v1017_v60 }
  0x9e   : > { %v1110_v38 = vpop.permute.xlu1 %1109  ;;  %v1108_v39 = vpop.permute.xlu0 %1107 }
  0x9f   : > { %v1113_v61 = vsel %vm1111_vm14, %v1110_v38, %v1108_v39  ;;  %v1112_v9 = vsel %vm1111_vm14, %v1108_v39, %v1110_v38  ;;  %v4237_v39 = vld [vmem:[%s5829_s3 + $0x8] sm:$0xff] }
  0xa0   : > { %4216 = vmatmul.mubr.msk.f32.vlgmr.msra.gmra.mrb[0].mxu0 %vm487_vm8, %v4213_v36  ;;  %v1115_v2 = vmul.f32 %v5139_v40, %v1113_v61  ;;  %v4242_v61 = vld [vmem:[%s5829_s3 + $0x18] sm:$0xff] }
  0xa1   : > { %4219 = vmatpush1.msk.msra.mxu0 %vm491_vm7, %v5042_v1  ;;  %910 = vmatprep.mubr.f32.mxu0 %v4900_v0  ;;  %v4221_v1 = vld [vmem:[%s5827_s1 + $0x28] sm:$0xff] }
  0xa2   : > { %4222 = vmatprep.subr.msk.mxu0 %vm491_vm7, %v927_v37  ;;  %v479_v43 = vpop.permute.xlu1 %478  ;;  %v477_v44 = vpop.permute.xlu0 %476 }
  0xa3   : > { %v482_v46 = vsel %vm480_vm12, %v479_v43, %v477_v44  ;;  %v481_v47 = vsel %vm480_vm12, %v477_v44, %v479_v43 }
  0xa4   : > { %v483_v48 = vmul.f32 %v5088_v12, %v482_v46  ;;  %4203 = vmatprep.subr.msk.mxu1 %vm491_vm7, %v481_v47 }
  0xa6   : > { %4204 = vmatpush1.msk.msra.mxu1 %vm491_vm7, %v483_v48  ;;  %v467_v54 = vpop.permute.xlu1 %466  ;;  %v465_v55 = vpop.permute.xlu0 %464 }
  0xa7   : > { %4205 = vmatmul.mubr.msk.f32.vlgmr.msra.gmra.mrb[0].mxu1 %vm487_vm8, %v4202_v49  ;;  %v469_v56 = vsel %vm468_vm13, %v465_v55, %v467_v54  ;;  %v470_v57 = vsel %vm468_vm13, %v467_v54, %v465_v55 }
  0xa8   : > { %4220 = vmatmul.mubr.msk.f32.vlgmr.msra.gmra.mrb[0].mxu0 %vm487_vm8, %v4217_v52  ;;  %v473_v58 = vmul.f32 %v5168_v50, %v470_v57  ;;  %v474_v59 = vmul.f32 %v5100_v17, %v469_v56  ;;  %642 = vmatprep.mubr.f32.mxu1 %v4900_v0  ;;  %v4240_v57 = vld [vmem:[%s5829_s3 + $0x10] sm:$0xff] }
  0xa9   : > { %4223 = vmatpush1.msk.msra.mxu0 %vm491_vm7, %v926_v51  ;;  %1003 = vmatprep.mubr.f32.mxu0 %v4900_v0 }
  0xaa   : > { %4226 = vmatprep.subr.msk.mxu0 %vm491_vm7, %v1022_v53  ;;  %4206 = vmatprep.subr.msk.mxu1 %vm491_vm7, %v474_v59  ;;  %v1203_v3 = vpop.permute.xlu1 %1202  ;;  %v1201_v4 = vpop.permute.xlu0 %1200 }
  0xab   : > { %4207 = vmatpush1.msk.msra.mxu1 %vm491_vm7, %v473_v58  ;;  %v1206_v7 = vsel %vm1204_vm15, %v1203_v3, %v1201_v4  ;;  %v1205_v11 = vsel %vm1204_vm15, %v1201_v4, %v1203_v3  ;;  %v4244_v4 = vld [vmem:[%s5829_s3 + $0x20] sm:$0xff] }
  0xac   : > { %v1210_v10 = vmul.f32 %v5212_v5, %v1206_v7  ;;  %v1209_v14 = vmul.f32 %v5091_v13, %v1205_v11 }
  0xaf   : > { %4208 = vmatmul.mubr.msk.f32.vlgmr.msra.gmra.mrb[0].mxu1 %vm487_vm8, %v475_v62 }
  0xb0   : > { %4224 = vmatmul.mubr.msk.f32.vlgmr.msra.gmra.mrb[0].mxu0 %vm487_vm8, %v4221_v1  ;;  %1392 = vmatprep.mubr.f32.mxu1 %v4900_v0 }
  0xb1   : > { %4227 = vmatpush1.msk.msra.mxu0 %vm491_vm7, %v1021_v63  ;;  %1098 = vmatprep.mubr.f32.mxu0 %v4900_v0 }
  0xb2   : > { %4230 = vmatprep.subr.msk.mxu0 %vm491_vm7, %v1115_v2 }
  0xb8   : > { %4228 = vmatmul.mubr.msk.f32.vlgmr.msra.gmra.mrb[0].mxu0 %vm487_vm8, %v4225_v8 }
  0xb9   : > { %4231 = vmatpush1.msk.msra.mxu0 %vm491_vm7, %v1112_v9  ;;  %1191 = vmatprep.mubr.f32.mxu0 %v4900_v0 }
  0xba   : > { %4234 = vmatprep.subr.msk.mxu0 %vm491_vm7, %v1210_v10 }
  0xbb   : > { %v1299_v24 = vpop.permute.xlu0 %1298 }
  0xc0   : > { %4232 = vmatmul.mubr.msk.f32.vlgmr.msra.gmra.mrb[0].mxu0 %vm487_vm8, %v4229_v15 }
  0xc1   : > { %4235 = vmatpush1.msk.msra.mxu0 %vm491_vm7, %v1209_v14  ;;  %1286 = vmatprep.mubr.f32.mxu0 %v4900_v0  ;;  %v4246_v14 = vld [vmem:[%s5829_s3 + $0x28] sm:$0xff]  ;;  %vm4029_vm7 = vcmask 523264  }
  0xc8   : > { %4236 = vmatmul.mubr.msk.f32.vlgmr.msra.gmra.mrb[0].mxu0 %vm487_vm8, %v4233_v19 }
 0x182   : > { %v644_v21 = vpop.f32.mrb[0].mxu1 }
 0x183   : > { %v646_v22 = vpop.f32.mrb[1].mxu1 }
 0x19b   : > { %v1288_v23 = vpop.f32.mrb[0].mxu0 }
 0x19c   : > { %v4654_v25 = vadd.f32 %v1288_v23, %v644_v21  ;;  %v1290_v26 = vpop.f32.mrb[1].mxu0  ;;  %v4248_v23 = vld [vmem:[%s5829_s3 + $0x30] sm:$0xff] }
 0x19d   : > { %v4655_v27 = vadd.f32 %v1290_v26, %v646_v22 }
 0x19e   : > { %v1301_v28 = vadd.f32 %v4654_v25, %v1299_v24  ;;  %v4250_v25 = vld [vmem:[%s5829_s3 + $0x38] sm:$0xff] }
 0x19f   : > { %v1302_v29 = vadd.f32 %v4655_v27, %v1299_v24 }
 0x1a0   : > { %v5239_v30 = vmax.f32 %v1301_v28, 0.0 }
 0x1a1   : > { %v1304_v31 = vmax.f32 %v1302_v29, 0.0 }
 0x1a2   : > { %1305 = vrot.lane.b32.xlu0 %v5239_v30, %s4907_s30  ;;  %1314 = vrot.lane.b32.xlu1 %v5239_v30, %s4906_s29 }
 0x1a6   : > { %1473 = vrot.lane.b32.xlu0 %v5239_v30, %s4901_s15  ;;  %1316 = vrot.lane.b32.xlu1 %v1304_v31, %s4906_s29  ;;  %s5860_s29 = smov 111  }
 0x1aa   : > { %1559 = vrot.lane.b32.xlu0 %v5239_v30, %s5842_s16  ;;  %1307 = vrot.lane.b32.xlu1 %v1304_v31, %s4907_s30  ;;  %s5861_s30 = smov 127  }
 0x1ae   : > { %1723 = vrot.lane.b32.xlu0 %v5239_v30, %s5843_s22  ;;  %1475 = vrot.lane.b32.xlu1 %v1304_v31, %s4901_s15  ;;  %s4912_s15 = smov 57  }
 0x1b2   : > { %1809 = vrot.lane.b32.xlu0 %v5239_v30, %s4904_s24  ;;  %1561 = vrot.lane.b32.xlu1 %v1304_v31, %s5842_s16  ;;  %s4914_s16 = smov 9  }
 0x1b6   : > { %1895 = vrot.lane.b32.xlu0 %v5239_v30, %s5859_s13  ;;  %1725 = vrot.lane.b32.xlu1 %v1304_v31, %s5843_s22  ;;  %s4917_s22 = smov 7  }
 0x1ba   : > { %1981 = vrot.lane.b32.xlu0 %v5239_v30, %s5860_s29  ;;  %1811 = vrot.lane.b32.xlu1 %v1304_v31, %s4904_s24  ;;  %s5862_s24 = smov 1  }
 0x1be   : > { %2070 = vperm.xlu0 %4783, %v2067_v32   ;;  %1897 = vrot.lane.b32.xlu1 %v1304_v31, %s5859_s13  ;;  %v2110_v32 = vld [vmem:[%s5835_s9 + $0x88] sm:$0xff] }
 0x1c2   : > { %1983 = vrot.lane.b32.xlu1 %v1304_v31, %s5860_s29  ;;  %s4924_s29 = smov 119  }
 0x214   : > { %v1315_v33 = vpop.permute.xlu1 %1314  ;;  %v1306_v34 = vpop.permute.xlu0 %1305 }
 0x218   : > { %v1317_v35 = vpop.permute.xlu1 %1316  ;;  %v1474_v45 = vpop.permute.xlu0 %1473 }
 0x219   : > { %v1319_v36 = vsel %vm480_vm12, %v1317_v35, %v1315_v33  ;;  %v1318_v37 = vsel %vm480_vm12, %v1315_v33, %v1317_v35  ;;  %v2093_v33 = vld [vmem:[%s5835_s9] sm:$0xff] }
 0x21a   : > { %v1320_v38 = vmul.f32 %v5088_v12, %v1319_v36  ;;  %1328 = vmatprep.subr.mxu1 %v1318_v37  ;;  %v2094_v36 = vld [vmem:[%s5835_s9 + $0x8] sm:$0xff]  ;;  %v2111_v37 = vld [vmem:[%s5835_s9 + $0x90] sm:$0xff] }
 0x21c   : > { %1329 = vmatpush1.msra.mxu1 %v1320_v38  ;;  %v1308_v41 = vpop.permute.xlu1 %1307  ;;  %v1560_v53 = vpop.permute.xlu0 %1559  ;;  %v2112_v38 = vld [vmem:[%s5835_s9 + $0x98] sm:$0xff] }
 0x21d   : > { %v1309_v43 = vsel %vm468_vm13, %v1306_v34, %v1308_v41  ;;  %v1310_v44 = vsel %vm468_vm13, %v1308_v41, %v1306_v34  ;;  %4238 = vmatmul.mubr.msk.f32.vlgmr.msra.gmra.mrb[2].mxu1 %vm1324_vm0, %v4237_v39  ;;  %v4572_v41 = vpack.c.bf16 %v2094_v36, %v2093_v33 }
 0x21e   : > { %v1311_v46 = vmul.f32 %v1310_v44, %v5168_v50  ;;  %v1312_v12 = vmul.f32 %v5100_v17, %v1309_v43  ;;  %1466 = vmatprep.mubr.f32.mxu1 %v4900_v0  ;;  %v1313_v50 = vld [vmem:[%s5829_s3] sm:$0xff]  ;;  %v4574_v43 = vpack.c.bf16 %v2112_v38, %v2111_v37  ;;  %v2095_v44 = vld [vmem:[%s5835_s9 + $0x10] sm:$0xff] }
 0x220   : > { %1402 = vmatprep.subr.mxu1 %v1312_v12  ;;  %v1476_v47 = vpop.permute.xlu1 %1475  ;;  %v2114_v12 = vld [vmem:[%s5835_s9 + $0xa8] sm:$0xff] }
 0x221   : > { %v1477_v48 = vsel %vm653_vm5, %v1474_v45, %v1476_v47  ;;  %v1478_v49 = vsel %vm653_vm5, %v1476_v47, %v1474_v45  ;;  %1403 = vmatpush1.msra.mxu1 %v1311_v46  ;;  %v2096_v45 = vld [vmem:[%s5835_s9 + $0x18] sm:$0xff]  ;;  %v2113_v46 = vld [vmem:[%s5835_s9 + $0xa0] sm:$0xff]  ;;  %vm2231_vm5 = vcmask 1048064  }
 0x222   : > { %v1479_v51 = vmul.f32 %v1478_v49, %v5096_v16  ;;  %v1480_v52 = vmul.f32 %v5103_v18, %v1477_v48  ;;  %v4576_v48 = vpack.c.bf16 %v2096_v45, %v2095_v44  ;;  %v4578_v49 = vpack.c.bf16 %v2114_v12, %v2113_v46 }
 0x224   : > { %1486 = vmatprep.subr.mxu1 %v1480_v52  ;;  %v1562_v54 = vpop.permute.xlu1 %1561  ;;  %v2098_v52 = vld [vmem:[%s5835_s9 + $0x28] sm:$0xff] }
 0x225   : > { %v1563_v55 = vsel %vm748_vm6, %v1560_v53, %v1562_v54  ;;  %4239 = vmatmul.mubr.msk.f32.vlgmr.msra.gmra.mrb[2].mxu1 %vm1324_vm0, %v1313_v50  ;;  %v1564_v16 = vsel %vm748_vm6, %v1562_v54, %v1560_v53  ;;  %v2115_v50 = vld [vmem:[%s5835_s9 + $0xb0] sm:$0xff]  ;;  %v2116_v53 = vld [vmem:[%s5835_s9 + $0xb8] sm:$0xff]  ;;  %vm3128_vm6 = vcmask 130048  }
 0x226   : > { %v1566_v56 = vmul.f32 %v5100_v17, %v1563_v55  ;;  %1487 = vmatpush1.msra.mxu1 %v1479_v51  ;;  %1550 = vmatprep.mubr.f32.mxu1 %v4900_v0  ;;  %v1565_v58 = vmul.f32 %v5106_v20, %v1564_v16  ;;  %v1724_v17 = vpop.permute.xlu0 %1723  ;;  %v2097_v51 = vld [vmem:[%s5835_s9 + $0x20] sm:$0xff]  ;;  %v4582_v55 = vpack.c.bf16 %v2116_v53, %v2115_v50  ;;  %v2100_v16 = vld [vmem:[%s5835_s9 + $0x38] sm:$0xff] }
 0x227   : > { %v4580_v54 = vpack.c.bf16 %v2098_v52, %v2097_v51 }
 0x228   : > { %1572 = vmatprep.subr.mxu1 %v1566_v56  ;;  %v1726_v59 = vpop.permute.xlu1 %1725  ;;  %v2099_v56 = vld [vmem:[%s5835_s9 + $0x30] sm:$0xff] }
 0x229   : > { %v1728_v60 = vsel %vm923_vm9, %v1726_v59, %v1724_v17  ;;  %v1727_v2 = vsel %vm923_vm9, %v1724_v17, %v1726_v59  ;;  %v4584_v59 = vpack.c.bf16 %v2100_v16, %v2099_v56 }
 0x22a   : > { %v1730_v62 = vmul.f32 %v5103_v18, %v1728_v60  ;;  %v1810_v1 = vpop.permute.xlu0 %1809  ;;  %v1729_v18 = vmul.f32 %v5091_v13, %v1727_v2  ;;  %v2101_v60 = vld [vmem:[%s5835_s9 + $0x40] sm:$0xff] }
 0x22c   : > { %v1812_v63 = vpop.permute.xlu1 %1811 }
 0x22d   : > { %4241 = vmatmul.mubr.msk.f32.vlgmr.msra.gmra.mrb[2].mxu1 %vm1324_vm0, %v4240_v57  ;;  %v1814_v3 = vsel %vm1016_vm11, %v1812_v63, %v1810_v1  ;;  %v1813_v10 = vsel %vm1016_vm11, %v1810_v1, %v1812_v63  ;;  %v2117_v57 = vld [vmem:[%s5835_s9 + $0xc0] sm:$0xff]  ;;  %v2120_v63 = vld [vmem:[%s5835_s9 + $0xd8] sm:$0xff] }
 0x22e   : > { %1573 = vmatpush1.msra.mxu1 %v1565_v58  ;;  %1636 = vmatprep.mubr.f32.mxu1 %v4900_v0  ;;  %v1816_v7 = vmul.f32 %v1814_v3, %v5152_v42  ;;  %v1896_v9 = vpop.permute.xlu0 %1895  ;;  %v1815_v42 = vmul.f32 %v5106_v20, %v1813_v10  ;;  %v2118_v58 = vld [vmem:[%s5835_s9 + $0xc8] sm:$0xff]  ;;  %v2103_v3 = vld [vmem:[%s5835_s9 + $0x50] sm:$0xff]  ;;  %v2105_v10 = vld [vmem:[%s5835_s9 + $0x60] sm:$0xff] }
 0x22f   : > { %1650 = vmatprep.subr.mxu1 %v1304_v31  ;;  %v4586_v17 = vpack.c.bf16 %v2118_v58, %v2117_v57 }
 0x230   : > { %v1898_v8 = vpop.permute.xlu1 %1897 }
 0x231   : > { %v1900_v11 = vsel %vm1111_vm14, %v1898_v8, %v1896_v9  ;;  %v1899_v20 = vsel %vm1111_vm14, %v1896_v9, %v1898_v8 }
 0x232   : > { %v1902_v15 = vmul.f32 %v5139_v40, %v1900_v11  ;;  %v1982_v21 = vpop.permute.xlu0 %1981  ;;  %v2106_v11 = vld [vmem:[%s5835_s9 + $0x68] sm:$0xff] }
 0x234   : > { %v1984_v19 = vpop.permute.xlu1 %1983 }
 0x235   : > { %4243 = vmatmul.mubr.msk.f32.vlgmr.msra.gmra.mrb[2].mxu1 %vm1324_vm0, %v4242_v61  ;;  %v1986_v22 = vsel %vm1204_vm15, %v1984_v19, %v1982_v21  ;;  %v1985_v24 = vsel %vm1204_vm15, %v1982_v21, %v1984_v19  ;;  %v2102_v61 = vld [vmem:[%s5835_s9 + $0x48] sm:$0xff]  ;;  %v2107_v21 = vld [vmem:[%s5835_s9 + $0x70] sm:$0xff] }
 0x236   : > { %1651 = vmatpush1.msra.mxu1 %v5239_v30  ;;  %1714 = vmatprep.mubr.f32.mxu1 %v4900_v0  ;;  %v1988_v40 = vmul.f32 %v1986_v22, %v5212_v5  ;;  %v1987_v26 = vmul.f32 %v5091_v13, %v1985_v24  ;;  %v4252_v5 = vld [vmem:[%s5829_s3 + $0x40] sm:$0xff]  ;;  %v4588_v1 = vpack.c.bf16 %v2102_v61, %v2101_v60  ;;  %v2108_v22 = vld [vmem:[%s5835_s9 + $0x78] sm:$0xff] }
 0x237   : > { %1736 = vmatprep.subr.mxu1 %v1730_v62  ;;  %v2109_v13 = vld [vmem:[%s5835_s9 + $0x80] sm:$0xff]  ;;  %v2119_v62 = vld [vmem:[%s5835_s9 + $0xd0] sm:$0xff] }
 0x238   : > { %v4570_v35 = vpack.c.bf16 %v2110_v32, %v2109_v13  ;;  %v4590_v2 = vpack.c.bf16 %v2120_v63, %v2119_v62 }
 0x23a   : > { %4571 = vmatprep.subr.bf16.mxu0 %v4570_v35 }
 0x23b   : > { %4573 = vmatpush3.bf16.msra.mxu0 %v4572_v41 }
 0x23c   : > { %4575 = vmatprep.subr.bf16.mxu0 %v4574_v43 }
 0x23d   : > { %4245 = vmatmul.mubr.msk.f32.vlgmr.msra.gmra.mrb[2].mxu1 %vm1324_vm0, %v4244_v4  ;;  %v2071_v27 = vpop.permute.xlu0 %2070  ;;  %v2104_v4 = vld [vmem:[%s5835_s9 + $0x58] sm:$0xff] }
 0x23e   : > { %1737 = vmatpush1.msra.mxu1 %v1729_v18  ;;  %1800 = vmatprep.mubr.f32.mxu1 %v4900_v0  ;;  %v2121_v18 = vld [vmem:[%s5835_s9 + $0xe0] sm:$0xff]  ;;  %v4592_v8 = vpack.c.bf16 %v2104_v4, %v2103_v3  ;;  %v3084_v3 = vld [vmem:[%s5832_s6 + $0x8] sm:$0xff] }
 0x23f   : > { %1822 = vmatprep.subr.mxu1 %v1816_v7  ;;  %4577 = vmatpush3.bf16.msra.mxu0 %v4576_v48  ;;  %v2122_v7 = vld [vmem:[%s5835_s9 + $0xe8] sm:$0xff]  ;;  %v3083_v4 = vld [vmem:[%s5832_s6] sm:$0xff] }
 0x240   : > { %4579 = vmatprep.subr.bf16.mxu0 %v4578_v49  ;;  %v4594_v9 = vpack.c.bf16 %v2122_v7, %v2121_v18  ;;  %v4259_v7 = vld [vmem:[%s5831_s5 + $0x18] sm:$0xff] }
 0x243   : > { %4581 = vmatpush3.bf16.msra.mxu0 %v4580_v54 }
 0x244   : > { %4583 = vmatprep.subr.bf16.mxu0 %v4582_v55 }
 0x245   : > { %4247 = vmatmul.mubr.msk.f32.vlgmr.msra.gmra.mrb[2].mxu1 %vm1324_vm0, %v4246_v14  ;;  %v4596_v14 = vpack.c.bf16 %v2106_v11, %v2105_v10  ;;  %v2245_v11 = vld [vmem:[%s5831_s5 + $0x8] sm:$0xff] }
 0x246   : > { %1823 = vmatpush1.msra.mxu1 %v1815_v42  ;;  %1886 = vmatprep.mubr.f32.mxu1 %v4900_v0  ;;  %v2123_v42 = vld [vmem:[%s5835_s9 + $0xf0] sm:$0xff] }
 0x247   : > { %1908 = vmatprep.subr.mxu1 %v1902_v15  ;;  %4585 = vmatpush3.bf16.msra.mxu0 %v4584_v59  ;;  %v2124_v15 = vld [vmem:[%s5835_s9 + $0xf8] sm:$0xff] }
 0x248   : > { %4587 = vmatprep.subr.bf16.mxu0 %v4586_v17  ;;  %v4598_v19 = vpack.c.bf16 %v2124_v15, %v2123_v42  ;;  %v4265_v15 = vld [vmem:[%s5831_s5 + $0x28] sm:$0xff] }
 0x24b   : > { %4589 = vmatpush3.bf16.msra.mxu0 %v4588_v1 }
 0x24c   : > { %4591 = vmatprep.subr.bf16.mxu0 %v4590_v2 }
 0x24d   : > { %4249 = vmatmul.mubr.msk.f32.vlgmr.msra.gmra.mrb[2].mxu1 %vm1324_vm0, %v4248_v23  ;;  %v4600_v23 = vpack.c.bf16 %v2108_v22, %v2107_v21  ;;  %v4269_v21 = vld [vmem:[%s5831_s5 + $0x38] sm:$0xff]  ;;  %v4272_v22 = vld [vmem:[%s5831_s5 + $0x40] sm:$0xff] }
 0x24e   : > { %1909 = vmatpush1.msra.mxu1 %v1899_v20  ;;  %1972 = vmatprep.mubr.f32.mxu1 %v4900_v0 }
 0x24f   : > { %1994 = vmatprep.subr.mxu1 %v1988_v40  ;;  %4593 = vmatpush3.bf16.msra.mxu0 %v4592_v8  ;;  %v2244_v8 = vld [vmem:[%s5831_s5] sm:$0xff] }
 0x250   : > { %4595 = vmatprep.subr.bf16.mxu0 %v4594_v9 }
 0x253   : > { %4597 = vmatpush3.bf16.msra.mxu0 %v4596_v14  ;;  %v4264_v14 = vld [vmem:[%s5831_s5 + $0x20] sm:$0xff] }
 0x254   : > { %4599 = vmatprep.subr.bf16.mxu0 %v4598_v19  ;;  %v4268_v19 = vld [vmem:[%s5831_s5 + $0x30] sm:$0xff] }
 0x255   : > { %4251 = vmatmul.mubr.msk.f32.vlgmr.msra.gmra.mrb[2].mxu1 %vm1324_vm0, %v4250_v25 }
 0x256   : > { %1995 = vmatpush1.msra.mxu1 %v1987_v26  ;;  %2058 = vmatprep.mubr.f32.mxu1 %v4900_v0 }
 0x257   : > { %4601 = vmatpush3.bf16.msra.mxu0 %v4600_v23 }
 0x25d   : > { %4253 = vmatmul.mubr.msk.f32.vlgmr.msra.gmra.mrb[2].mxu1 %vm1324_vm0, %v4252_v5 }
 0x330   : > { %v2060_v28 = vpop.f32.mrb[2].mxu1 }
 0x331   : > { %v5359_v29 = vadd.f32 %v2071_v27, %v2060_v28  ;;  %v2062_v30 = vpop.f32.mrb[3].mxu1 }
 0x332   : > { %v5361_v31 = vadd.f32 %v2071_v27, %v2062_v30 }
 0x333   : > { %v2075_v34 = vmax.f32 %v5359_v29, 0.0  ;;  %v2199_v29 = vand.u32 63, %v5083_v6 }
 0x334   : > { %v2076_v39 = vmax.f32 %v5361_v31, 0.0 }
 0x335   : > { %v2211_v31 = vand.u32 7, %v2199_v29  ;;  %vm2219_vm1 = vcmp.ge.s32.totalorder %v2199_v29, 8  ;;  %vm2222_vm3 = vcmp.lt.s32.totalorder %v2199_v29, 56 }
 0x336   : > { %v4784_v47 = vpack.i.bf16 %v2076_v39, %v2075_v34  ;;  %v4254_v41 = vsel %vm2219_vm1, 1.0, %v4900_v0  ;;  %v4255_v6 = vsel %vm2222_vm3, 1.0, %v4900_v0 }
 0x337   : > { %vm2228_vm2 = vcmp.le.s32.totalorder %v2211_v31, 6  ;;  %vm2225_vm4 = vcmp.ge.s32.totalorder %v2211_v31, 1 }
 0x338   : > { %4785 = vrot.lane.b32.xlu1 %v4784_v47, %s5859_s13  ;;  %s5853_s13 = smov 64   ;;  %v4257_v43 = vsel %vm2228_vm2, 1.0, %v4900_v0  ;;  %v4256_v46 = vsel %vm2225_vm4, 1.0, %v4900_v0  ;;  %v4258_v0 = vld [vmem:[%s5831_s5 + $0x10] sm:$0xff] }
 0x339   : > { %v2424_v44 = vmul.f32 %v4257_v43, %v4254_v41  ;;  %v2987_v45 = vmul.f32 %v4257_v43, %v4255_v6  ;;  %v2238_v48 = vmul.f32 %v4256_v46, %v4254_v41  ;;  %v2796_v49 = vmul.f32 %v4256_v46, %v4255_v6  ;;  %4445 = vmatprep.mubr.msk.f32.mxu1 %vm1324_vm0, %v4258_v0 }
 0x3aa   : > { %v4786_v20 = vpop.permute.xlu1 %4785 }
 0x3ab   : > { %v4788_v40 = vunpack.i.h.bf16 %v4786_v20  ;;  %v4787_v24 = vunpack.i.l.bf16 %v4786_v20  ;;  %v4273_v20 = vld [vmem:[%s5831_s5 + $0x48] sm:$0xff] }
 0x3ad   : > { %v2081_v25 = vsel %vm1111_vm14, %v4787_v24, %v4788_v40  ;;  %v2082_v26 = vsel %vm1111_vm14, %v4788_v40, %v4787_v24  ;;  %v4276_v40 = vld [vmem:[%s5831_s5 + $0x50] sm:$0xff] }
 0x3ae   : > { %v2083_v5 = vmax.f32 %v2075_v34, %v2081_v25  ;;  %v2084_v27 = vmax.f32 %v2076_v39, %v2082_v26  ;;  %v4277_v25 = vld [vmem:[%s5831_s5 + $0x58] sm:$0xff]  ;;  %v4280_v26 = vld [vmem:[%s5831_s5 + $0x60] sm:$0xff] }
 0x3b0   : > { %v4789_v28 = vpack.i.bf16 %v2084_v27, %v2083_v5 }
 0x3b2   : > { %4790 = vrot.lane.b32.xlu0 %v4789_v28, %s5861_s30  ;;  %v4284_v28 = vld [vmem:[%s5831_s5 + $0x70] sm:$0xff] }
 0x424   : > { %v4791_v30 = vpop.permute.xlu0 %4790 }
 0x425   : > { %v4793_v13 = vunpack.i.h.bf16 %v4791_v30  ;;  %v4792_v32 = vunpack.i.l.bf16 %v4791_v30 }
 0x427   : > { %v2089_v33 = vsel %vm923_vm9, %v4792_v32, %v4793_v13  ;;  %v2090_v35 = vsel %vm923_vm9, %v4793_v13, %v4792_v32  ;;  %v4285_v13 = vld [vmem:[%s5831_s5 + $0x78] sm:$0xff]  ;;  %v4288_v32 = vld [vmem:[%s5831_s5 + $0x80] sm:$0xff] }
 0x428   : > { %v2091_v36 = vmax.f32 %v2083_v5, %v2089_v33  ;;  %v2092_v37 = vmax.f32 %v2084_v27, %v2090_v35  ;;  %v4281_v27 = vld [vmem:[%s5831_s5 + $0x68] sm:$0xff] }
 0x429   : > { %v4289_v33 = vld [vmem:[%s5831_s5 + $0x88] sm:$0xff] }
 0x42a   : > { %2189 = vmatprep.mubr.f32.mxu0 %v2092_v37 }
 0x42b   : > { %2190 = vmatmul.mubr.f32.vlgmr.msra.gmra.mrb[2].mxu0 %v2091_v36 }
 0x4fe   : > { %v4367_v34 = vpop.f32.mrb[2].mxu0 }
 0x4ff   : > { %v4368_v38 = vpop.f32.mrb[3].mxu0 }
 0x500   : > { %v5480_v39 = vadd.f32 %v4368_v38, %v4367_v34 }
 0x502   : > { %2232 = vrot.lane.b32.xlu1 %v5480_v39, %s5853_s13 }
 0x506   : > { %2247 = vrot.lane.b32.xlu1 %v4254_v41, %s4911_s14 }
 0x50a   : > { %2426 = vrot.lane.b32.xlu1 %v2424_v44, %s4912_s15  ;;  %s5852_s15 = smov 72  }
 0x50e   : > { %2702 = vrot.lane.b32.xlu1 %v4257_v43, %s5862_s24  ;;  %s5847_s24 = smov 71  }
 0x512   : > { %2893 = vrot.lane.b32.xlu1 %v4255_v6, %s5845_s25  ;;  %s5863_s25 = smov 72  }
 0x516   : > { %2989 = vrot.lane.b32.xlu1 %v2987_v45, %s4914_s16  ;;  %s5850_s16 = smov 73  }
 0x574   : > { %v2233_v12 = vpop.permute.xlu1 %2232 }
 0x575   : > { %v2234_v47 = vsel %vm2231_vm5, %v2233_v12, %v5480_v39 }
 0x576   : > { %2235 = vrot.lane.b32.xlu0 %v2234_v47, %s5853_s13 }
 0x578   : > { %v5493_v51 = vpop.permute.xlu1 %2247 }
 0x57a   : > { %2240 = vrot.lane.b32.xlu0 %v2238_v48, %s4915_s12  ;;  %s5846_s12 = smov 65  }
 0x57c   : > { %v5499_v52 = vpop.permute.xlu1 %2426 }
 0x57e   : > { %2521 = vrot.lane.b32.xlu0 %v4256_v46, %s4916_s0  ;;  %s5848_s0 = smov 120   ;;  %v4292_v46 = vld [vmem:[%s5833_s7 + $0x10] sm:$0xff] }
 0x57f   : > { %4492 = vmatprep.mubr.msk.f32.mxu0 %vm3128_vm6, %v4292_v46 }
 0x580   : > { %v5505_v56 = vpop.permute.xlu1 %2702 }
 0x582   : > { %2798 = vrot.lane.b32.xlu0 %v2796_v49, %s4917_s22  ;;  %s5851_s22 = smov 121  }
 0x584   : > { %v5517_v17 = vpop.permute.xlu1 %2893 }
 0x588   : > { %v5526_v1 = vpop.permute.xlu1 %2989 }
 0x5e8   : > { %v2236_v50 = vpop.permute.xlu0 %2235 }
 0x5e9   : > { %v2237_v53 = vsel %vm2231_vm5, %v2236_v50, %v5480_v39 }
 0x5ea   : > { %v2250_v54 = vmul.f32 %v5493_v51, %v2237_v53  ;;  %v2429_v55 = vmul.f32 %v5499_v52, %v2237_v53  ;;  %v2705_v58 = vmul.f32 %v5505_v56, %v2237_v53  ;;  %v2896_v61 = vmul.f32 %v5517_v17, %v2237_v53 }
 0x5eb   : > { %v2992_v2 = vmul.f32 %v5526_v1, %v2237_v53 }
 0x5ec   : > { %v5507_v16 = vpop.permute.xlu0 %2240  ;;  %2255 = vrot.lane.b32.xlu0 %v2250_v54, %s5852_s15  ;;  %2434 = vrot.lane.b32.xlu1 %v2429_v55, %s5847_s24  ;;  %s5864_s24 = smov 73   ;;  %s5867_s15 = smov 121  }
 0x5ed   : > { %v2243_v57 = vmul.f32 %v5507_v16, %v2237_v53 }
 0x5f0   : > { %v5513_v59 = vpop.permute.xlu0 %2521  ;;  %2340 = vrot.lane.b32.xlu0 %v2243_v57, %s5850_s16  ;;  %2710 = vrot.lane.b32.xlu1 %v2705_v58, %s5861_s30  ;;  %s5865_s16 = smov 71  }
 0x5f1   : > { %v2524_v60 = vmul.f32 %v5513_v59, %v2237_v53 }
 0x5f4   : > { %v5521_v62 = vpop.permute.xlu0 %2798  ;;  %2529 = vrot.lane.b32.xlu0 %v2524_v60, %s5846_s12  ;;  %2901 = vrot.lane.b32.xlu1 %v2896_v61, %s5848_s0  ;;  %s5866_s12 = smov 65   ;;  %s5868_s0 = smov 120  }
 0x5f5   : > { %v2801_v63 = vmul.f32 %v5521_v62, %v2237_v53 }
 0x5f8   : > { %2806 = vrot.lane.b32.xlu0 %v2801_v63, %s5851_s22  ;;  %3087 = vperm.xlu1 %4794, %v3083_v4   ;;  %s5869_s22 = smov 64  }
 0x5fc   : > { %2997 = vrot.lane.b32.xlu0 %v2992_v2, %s4924_s29 }
 0x600   : > { %3092 = vperm.xlu0 %4783, %v3084_v3  }
 0x65e   : > { %v2256_v18 = vpop.permute.xlu0 %2255  ;;  %v2435_v10 = vpop.permute.xlu1 %2434 }
 0x65f   : > { %4443 = vmatprep.subr.mxu1 %v2256_v18 }
 0x660   : > { %4444 = vmatpush3.msra.mxu1 %v2256_v18 }
 0x661   : > { %4446 = vmatmul.mubr.msk.f32.vlgmr.msra.gmra.mrb[4].mxu1 %vm1324_vm0, %v4259_v7 }
 0x662   : > { %v2341_v9 = vpop.permute.xlu0 %2340  ;;  %4450 = vmatprep.mubr.msk.f32.mxu1 %vm1324_vm0, %v2244_v8  ;;  %v2711_v23 = vpop.permute.xlu1 %2710 }
 0x663   : > { %4448 = vmatprep.subr.mxu1 %v2341_v9 }
 0x664   : > { %4449 = vmatpush3.msra.mxu1 %v2341_v9 }
 0x665   : > { %4453 = vmatprep.subr.mxu1 %v2435_v10 }
 0x666   : > { %v2530_v42 = vpop.permute.xlu0 %2529  ;;  %v2902_v5 = vpop.permute.xlu1 %2901 }
 0x669   : > { %4451 = vmatmul.mubr.msk.f32.vlgmr.msra.gmra.mrb[4].mxu1 %vm1324_vm0, %v2245_v11 }
 0x66a   : > { %4454 = vmatpush3.msra.mxu1 %v2435_v10  ;;  %4455 = vmatprep.mubr.msk.f32.mxu1 %vm1324_vm0, %v4264_v14  ;;  %v2807_v24 = vpop.permute.xlu0 %2806  ;;  %v3961_v10 = vld [vmem:[%s5834_s8] sm:$0xff] }
 0x66b   : > { %4458 = vmatprep.subr.mxu1 %v2530_v42 }
 0x66e   : > { %v2998_v30 = vpop.permute.xlu0 %2997 }
 0x671   : > { %4456 = vmatmul.mubr.msk.f32.vlgmr.msra.gmra.mrb[4].mxu1 %vm1324_vm0, %v4265_v15 }
 0x672   : > { %4459 = vmatpush3.msra.mxu1 %v2530_v42  ;;  %4460 = vmatprep.mubr.msk.f32.mxu1 %vm1324_vm0, %v4268_v19 }
 0x673   : > { %4463 = vmatprep.subr.mxu1 %v5480_v39 }
 0x677   : > { %v3088_v35 = vpop.permute.xlu1 %3087 }
 0x679   : > { %4461 = vmatmul.mubr.msk.f32.vlgmr.msra.gmra.mrb[4].mxu1 %vm1324_vm0, %v4269_v21 }
 0x67a   : > { %4464 = vmatpush3.msra.mxu1 %v5480_v39  ;;  %4465 = vmatprep.mubr.msk.f32.mxu1 %vm1324_vm0, %v4272_v22 }
 0x67b   : > { %4468 = vmatprep.subr.mxu1 %v2711_v23 }
 0x67f   : > { %v3093_v36 = vpop.permute.xlu0 %3092 }
 0x681   : > { %4466 = vmatmul.mubr.msk.f32.vlgmr.msra.gmra.mrb[4].mxu1 %vm1324_vm0, %v4273_v20 }
 0x682   : > { %4469 = vmatpush3.msra.mxu1 %v2711_v23  ;;  %4470 = vmatprep.mubr.msk.f32.mxu1 %vm1324_vm0, %v4276_v40 }
 0x683   : > { %4473 = vmatprep.subr.mxu1 %v2807_v24 }
 0x689   : > { %4471 = vmatmul.mubr.msk.f32.vlgmr.msra.gmra.mrb[4].mxu1 %vm1324_vm0, %v4277_v25  ;;  %v3113_v25 = vld [vmem:[%s5833_s7] sm:$0xff] }
 0x68a   : > { %4474 = vmatpush3.msra.mxu1 %v2807_v24  ;;  %4475 = vmatprep.mubr.msk.f32.mxu1 %vm1324_vm0, %v4280_v26  ;;  %v4293_v24 = vld [vmem:[%s5833_s7 + $0x18] sm:$0xff] }
 0x68b   : > { %4478 = vmatprep.subr.mxu1 %v2902_v5 }
 0x691   : > { %4476 = vmatmul.mubr.msk.f32.vlgmr.msra.gmra.mrb[4].mxu1 %vm1324_vm0, %v4281_v27 }
 0x692   : > { %4479 = vmatpush3.msra.mxu1 %v2902_v5  ;;  %4480 = vmatprep.mubr.msk.f32.mxu1 %vm1324_vm0, %v4284_v28 }
 0x693   : > { %4483 = vmatprep.subr.mxu1 %v2998_v30 }
 0x699   : > { %4481 = vmatmul.mubr.msk.f32.vlgmr.msra.gmra.mrb[4].mxu1 %vm1324_vm0, %v4285_v13  ;;  %v4298_v13 = vld [vmem:[%s5833_s7 + $0x20] sm:$0xff] }
 0x69a   : > { %4484 = vmatpush3.msra.mxu1 %v2998_v30  ;;  %4485 = vmatprep.mubr.msk.f32.mxu1 %vm1324_vm0, %v4288_v32  ;;  %v3114_v30 = vld [vmem:[%s5833_s7 + $0x8] sm:$0xff] }
 0x6a1   : > { %4486 = vmatmul.mubr.msk.f32.vlgmr.msra.gmra.mrb[4].mxu1 %vm1324_vm0, %v4289_v33  ;;  %v4299_v33 = vld [vmem:[%s5833_s7 + $0x28] sm:$0xff] }
 0x774   : > { %v4487_v37 = vpop.f32.mrb[4].mxu1 }
 0x775   : > { %v3096_v29 = vadd.f32 %v4487_v37, %v3093_v36  ;;  %v3072_v31 = vpop.f32.mrb[5].mxu1 }
 0x776   : > { %v3095_v34 = vadd.f32 %v3088_v35, %v3072_v31  ;;  %v4302_v35 = vld [vmem:[%s5833_s7 + $0x30] sm:$0xff] }
 0x777   : > { %v5607_v38 = vmax.f32 %v3096_v29, 0.0 }
 0x778   : > { %v5609_v39 = vmax.f32 %v3095_v34, 0.0  ;;  %v4303_v34 = vld [vmem:[%s5833_s7 + $0x38] sm:$0xff] }
 0x779   : > { %3102 = vrot.lane.b32.xlu0 %v5607_v38, %s5853_s13 }
 0x77a   : > { %3099 = vrot.lane.b32.xlu1 %v5609_v39, %s5853_s13  ;;  %v4618_v36 = vpack.c.bf16 %v5607_v38, %v5609_v39 }
 0x7eb   : > { %v3103_v41 = vpop.permute.xlu0 %3102 }
 0x7ec   : > { %v3100_v43 = vpop.permute.xlu1 %3099  ;;  %v3104_v44 = vsel %vm2231_vm5, %v3103_v41, %v5607_v38  ;;  %v4306_v41 = vld [vmem:[%s5833_s7 + $0x40] sm:$0xff] }
 0x7ed   : > { %3107 = vrot.lane.b32.xlu0 %v3104_v44, %s5853_s13  ;;  %v3101_v6 = vsel %vm2231_vm5, %v3100_v43, %v5609_v39 }
 0x7ee   : > { %3105 = vrot.lane.b32.xlu1 %v3101_v6, %s5853_s13  ;;  %v4307_v6 = vld [vmem:[%s5833_s7 + $0x48] sm:$0xff] }
 0x85f   : > { %v3108_v45 = vpop.permute.xlu0 %3107 }
 0x860   : > { %v3110_v12 = vsel %vm2231_vm5, %v3108_v45, %v5607_v38  ;;  %v3106_v47 = vpop.permute.xlu1 %3105  ;;  %v4310_v45 = vld [vmem:[%s5833_s7 + $0x50] sm:$0xff] }
 0x861   : > { %v3109_v48 = vsel %vm2231_vm5, %v3106_v47, %v5609_v39  ;;  %v3116_v49 = vmul.f32 %v3110_v12, %v5493_v51  ;;  %v3112_v0 = vmul.f32 %v3110_v12, %v5507_v16  ;;  %v3300_v55 = vmul.f32 %v3110_v12, %v5499_v52 }
 0x862   : > { %v3115_v50 = vmul.f32 %v3109_v48, %v5493_v51  ;;  %v3111_v53 = vmul.f32 %v3109_v48, %v5507_v16  ;;  %v3299_v54 = vmul.f32 %v3109_v48, %v5499_v52  ;;  %v3395_v60 = vmul.f32 %v3109_v48, %v5513_v59 }
 0x863   : > { %v3396_v61 = vmul.f32 %v3110_v12, %v5513_v59  ;;  %v3577_v63 = vmul.f32 %v3109_v48, %v5505_v56  ;;  %v3578_v51 = vmul.f32 %v3110_v12, %v5505_v56  ;;  %v3673_v3 = vmul.f32 %v3109_v48, %v5521_v62 }
 0x864   : > { %v4795_v57 = vpack.i.bf16 %v3116_v49, %v3115_v50  ;;  %v4800_v58 = vpack.i.bf16 %v3112_v0, %v3111_v53  ;;  %v4805_v2 = vpack.i.bf16 %v3300_v55, %v3299_v54  ;;  %v3674_v52 = vmul.f32 %v3110_v12, %v5521_v62  ;;  %v4311_v49 = vld [vmem:[%s5833_s7 + $0x58] sm:$0xff]  ;;  %v4314_v0 = vld [vmem:[%s5833_s7 + $0x60] sm:$0xff] }
 0x865   : > { %v4810_v16 = vpack.i.bf16 %v3396_v61, %v3395_v60  ;;  %v4815_v4 = vpack.i.bf16 %v3578_v51, %v3577_v63  ;;  %v3769_v59 = vmul.f32 %v3109_v48, %v5517_v17  ;;  %v3770_v7 = vmul.f32 %v3110_v12, %v5517_v17  ;;  %v3962_v17 = vld [vmem:[%s5834_s8 + $0x8] sm:$0xff]  ;;  %v4319_v61 = vld [vmem:[%s5833_s7 + $0x78] sm:$0xff]  ;;  %v4322_v63 = vld [vmem:[%s5833_s7 + $0x80] sm:$0xff] }
 0x866   : > { %4796 = vrot.lane.b32.xlu1 %v4795_v57, %s5863_s25  ;;  %4801 = vrot.lane.b32.xlu0 %v4800_v58, %s5864_s24  ;;  %v4820_v18 = vpack.i.bf16 %v3674_v52, %v3673_v3  ;;  %v3865_v8 = vmul.f32 %v3109_v48, %v5526_v1  ;;  %v3866_v56 = vmul.f32 %v3110_v12, %v5526_v1  ;;  %v4315_v57 = vld [vmem:[%s5833_s7 + $0x68] sm:$0xff]  ;;  %v4318_v58 = vld [vmem:[%s5833_s7 + $0x70] sm:$0xff] }
 0x867   : > { %v4825_v9 = vpack.i.bf16 %v3770_v7, %v3769_v59  ;;  %v4323_v51 = vld [vmem:[%s5833_s7 + $0x88] sm:$0xff] }
 0x868   : > { %v4830_v62 = vpack.i.bf16 %v3866_v56, %v3865_v8 }
 0x86a   : > { %4806 = vrot.lane.b32.xlu1 %v4805_v2, %s5865_s16  ;;  %4811 = vrot.lane.b32.xlu0 %v4810_v16, %s5866_s12 }
 0x86e   : > { %4816 = vrot.lane.b32.xlu1 %v4815_v4, %s5861_s30  ;;  %4821 = vrot.lane.b32.xlu0 %v4820_v18, %s5867_s15  ;;  %s4334_s15 = sshll.u32 %s5008_s21, 8  ;;  %s4925_s21 = smov [#allocation2]  }
 0x86f   : > { %s4840_s24 = sshll.u32 %s4925_s21, 4  ;;  %s4841_s24 = int_to_ptr.vmem [resolvable:$false] %s4840_s24 }
 0x872   : > { %4826 = vrot.lane.b32.xlu1 %v4825_v9, %s5868_s0  ;;  %4831 = vrot.lane.b32.xlu0 %v4830_v62, %s4924_s29 }
 0x876   : > { %3965 = vperm.xlu1 %4794, %v3961_v10   ;;  %3970 = vperm.xlu0 %4783, %v3962_v17  }
 0x8d8   : > { %v4797_v1 = vpop.permute.xlu1 %4796  ;;  %v4802_v11 = vpop.permute.xlu0 %4801 }
 0x8d9   : > { %v4799_v14 = vunpack.i.h.bf16 %v4797_v1  ;;  %v4798_v42 = vunpack.i.l.bf16 %v4797_v1  ;;  %v4804_v15 = vunpack.i.h.bf16 %v4802_v11  ;;  %v4803_v19 = vunpack.i.l.bf16 %v4802_v11 }
 0x8db   : > { %v4602_v21 = vpack.c.bf16 %v4799_v14, %v4798_v42  ;;  %v4606_v23 = vpack.c.bf16 %v4804_v15, %v4803_v19 }
 0x8dc   : > { %v4807_v22 = vpop.permute.xlu1 %4806  ;;  %v4812_v5 = vpop.permute.xlu0 %4811 }
 0x8dd   : > { %v4809_v20 = vunpack.i.h.bf16 %v4807_v22  ;;  %v4808_v40 = vunpack.i.l.bf16 %v4807_v22  ;;  %4603 = vmatprep.subr.bf16.mxu0 %v4602_v21  ;;  %v4814_v27 = vunpack.i.h.bf16 %v4812_v5  ;;  %v4813_v28 = vunpack.i.l.bf16 %v4812_v5  ;;  %v4022_v22 = vld [vmem:[%s5836_s10 + $0x8] sm:$0xff] }
 0x8de   : > { %4605 = vmatpush3.bf16.msra.mxu0 %v4602_v21  ;;  %v4021_v21 = vld [vmem:[%s5836_s10] sm:$0xff] }
 0x8df   : > { %4607 = vmatprep.subr.bf16.mxu0 %v4606_v23  ;;  %v4610_v26 = vpack.c.bf16 %v4809_v20, %v4808_v40  ;;  %v4614_v32 = vpack.c.bf16 %v4814_v27, %v4813_v28  ;;  %v4638_v20 = vpack.c.bf16 %v4022_v22, %v4021_v21  ;;  %v4024_v40 = vld [vmem:[%s5836_s10 + $0x18] sm:$0xff] }
 0x8e0   : > { %v4817_v37 = vpop.permute.xlu1 %4816  ;;  %v4822_v44 = vpop.permute.xlu0 %4821 }
 0x8e1   : > { %4493 = vmatmul.mubr.msk.f32.vlgmr.msra.gmra.mrb[4].mxu0 %vm3128_vm6, %v4293_v24  ;;  %v4819_v29 = vunpack.i.h.bf16 %v4817_v37  ;;  %v4818_v31 = vunpack.i.l.bf16 %v4817_v37  ;;  %v4824_v38 = vunpack.i.h.bf16 %v4822_v44  ;;  %v4823_v39 = vunpack.i.l.bf16 %v4822_v44  ;;  %4639 = vmatprep.subr.bf16.mxu1 %v4638_v20 }
 0x8e2   : > { %4609 = vmatpush3.bf16.msra.mxu0 %v4606_v23  ;;  %4499 = vmatprep.mubr.msk.f32.mxu0 %vm3128_vm6, %v3113_v25  ;;  %v4023_v23 = vld [vmem:[%s5836_s10 + $0x10] sm:$0xff]  ;;  %v4025_v25 = vld [vmem:[%s5836_s10 + $0x20] sm:$0xff] }
 0x8e3   : > { %4611 = vmatprep.subr.bf16.mxu0 %v4610_v26  ;;  %v4622_v43 = vpack.c.bf16 %v4819_v29, %v4818_v31  ;;  %v4626_v46 = vpack.c.bf16 %v4824_v38, %v4823_v39  ;;  %v4642_v24 = vpack.c.bf16 %v4024_v40, %v4023_v23  ;;  %4641 = vmatpush3.bf16.msra.mxu1 %v4638_v20 }
 0x8e4   : > { %v4827_v12 = vpop.permute.xlu1 %4826  ;;  %v4832_v53 = vpop.permute.xlu0 %4831 }
 0x8e5   : > { %v4829_v47 = vunpack.i.h.bf16 %v4827_v12  ;;  %v4828_v48 = vunpack.i.l.bf16 %v4827_v12  ;;  %v4834_v54 = vunpack.i.h.bf16 %v4832_v53  ;;  %v4833_v55 = vunpack.i.l.bf16 %v4832_v53  ;;  %4643 = vmatprep.subr.bf16.mxu1 %v4642_v24 }
 0x8e7   : > { %v4630_v50 = vpack.c.bf16 %v4829_v47, %v4828_v48  ;;  %v4634_v60 = vpack.c.bf16 %v4834_v54, %v4833_v55  ;;  %4645 = vmatpush3.bf16.msra.mxu1 %v4642_v24 }
 0x8e9   : > { %4500 = vmatmul.mubr.msk.f32.vlgmr.msra.gmra.mrb[4].mxu0 %vm3128_vm6, %v3114_v30 }
 0x8ea   : > { %4613 = vmatpush3.bf16.msra.mxu0 %v4610_v26  ;;  %4506 = vmatprep.mubr.msk.f32.mxu0 %vm3128_vm6, %v4298_v13  ;;  %v4026_v26 = vld [vmem:[%s5836_s10 + $0x28] sm:$0xff] }
 0x8eb   : > { %4615 = vmatprep.subr.bf16.mxu0 %v4614_v32  ;;  %v4646_v5 = vpack.c.bf16 %v4026_v26, %v4025_v25 }
 0x8ed   : > { %4647 = vmatprep.subr.bf16.mxu1 %v4646_v5 }
 0x8ee   : > { %4649 = vmatpush3.bf16.msra.mxu1 %v4646_v5 }
 0x8f1   : > { %4507 = vmatmul.mubr.msk.f32.vlgmr.msra.gmra.mrb[4].mxu0 %vm3128_vm6, %v4299_v33  ;;  %v4028_v33 = vld [vmem:[%s5836_s10 + $0x38] sm:$0xff] }
 0x8f2   : > { %4617 = vmatpush3.bf16.msra.mxu0 %v4614_v32  ;;  %4513 = vmatprep.mubr.msk.f32.mxu0 %vm3128_vm6, %v4302_v35  ;;  %v4027_v32 = vld [vmem:[%s5836_s10 + $0x30] sm:$0xff] }
 0x8f3   : > { %4619 = vmatprep.subr.bf16.mxu0 %v4618_v36  ;;  %v4650_v35 = vpack.c.bf16 %v4028_v33, %v4027_v32 }
 0x8f5   : > { %v3971_v2 = vpop.permute.xlu0 %3970  ;;  %v3966_v3 = vpop.permute.xlu1 %3965  ;;  %4651 = vmatprep.subr.bf16.mxu1 %v4650_v35 }
 0x8f6   : > { %4653 = vmatpush3.bf16.msra.mxu1 %v4650_v35 }
 0x8f9   : > { %4514 = vmatmul.mubr.msk.f32.vlgmr.msra.gmra.mrb[4].mxu0 %vm3128_vm6, %v4303_v34 }
 0x8fa   : > { %4621 = vmatpush3.bf16.msra.mxu0 %v4618_v36  ;;  %4520 = vmatprep.mubr.msk.f32.mxu0 %vm3128_vm6, %v4306_v41 }
 0x8fb   : > { %4623 = vmatprep.subr.bf16.mxu0 %v4622_v43 }
 0x901   : > { %4521 = vmatmul.mubr.msk.f32.vlgmr.msra.gmra.mrb[4].mxu0 %vm3128_vm6, %v4307_v6 }
 0x902   : > { %4625 = vmatpush3.bf16.msra.mxu0 %v4622_v43  ;;  %4527 = vmatprep.mubr.msk.f32.mxu0 %vm3128_vm6, %v4310_v45 }
 0x903   : > { %4627 = vmatprep.subr.bf16.mxu0 %v4626_v46 }
 0x909   : > { %4528 = vmatmul.mubr.msk.f32.vlgmr.msra.gmra.mrb[4].mxu0 %vm3128_vm6, %v4311_v49 }
 0x90a   : > { %4629 = vmatpush3.bf16.msra.mxu0 %v4626_v46  ;;  %4534 = vmatprep.mubr.msk.f32.mxu0 %vm3128_vm6, %v4314_v0 }
 0x90b   : > { %4631 = vmatprep.subr.bf16.mxu0 %v4630_v50 }
 0x911   : > { %4535 = vmatmul.mubr.msk.f32.vlgmr.msra.gmra.mrb[4].mxu0 %vm3128_vm6, %v4315_v57 }
 0x912   : > { %4633 = vmatpush3.bf16.msra.mxu0 %v4630_v50  ;;  %4541 = vmatprep.mubr.msk.f32.mxu0 %vm3128_vm6, %v4318_v58 }
 0x913   : > { %4635 = vmatprep.subr.bf16.mxu0 %v4634_v60 }
 0x919   : > { %4542 = vmatmul.mubr.msk.f32.vlgmr.msra.gmra.mrb[4].mxu0 %vm3128_vm6, %v4319_v61 }
 0x91a   : > { %4637 = vmatpush3.bf16.msra.mxu0 %v4634_v60  ;;  %4548 = vmatprep.mubr.msk.f32.mxu0 %vm3128_vm6, %v4322_v63 }
 0x921   : > { %4549 = vmatmul.mubr.msk.f32.vlgmr.msra.gmra.mrb[4].mxu0 %vm3128_vm6, %v4323_v51 }
 0x9f4   : > { %v4550_v16 = vpop.f32.mrb[4].mxu0 }
 0x9f5   : > { %v3974_v52 = vadd.f32 %v4550_v16, %v3971_v2  ;;  %v3950_v4 = vpop.f32.mrb[5].mxu0 }
 0x9f6   : > { %v3973_v59 = vadd.f32 %v3966_v3, %v3950_v4 }
 0x9f7   : > { %v3976_v18 = vmax.f32 %v3974_v52, 0.0 }
 0x9f8   : > { %v3975_v7 = vmax.f32 %v3973_v59, 0.0 }
 0x9f9   : > { %3980 = vrot.lane.b32.xlu0 %v3976_v18, %s5853_s13 }
 0x9fa   : > { %3977 = vrot.lane.b32.xlu1 %v3975_v7, %s5853_s13 }
 0xa6b   : > { %v3981_v8 = vpop.permute.xlu0 %3980 }
 0xa6c   : > { %v3978_v56 = vpop.permute.xlu1 %3977  ;;  %v3982_v9 = vsel %vm2231_vm5, %v3981_v8, %v3976_v18 }
 0xa6d   : > { %3985 = vrot.lane.b32.xlu0 %v3982_v9, %s5853_s13  ;;  %v3979_v62 = vsel %vm2231_vm5, %v3978_v56, %v3975_v7 }
 0xa6e   : > { %3983 = vrot.lane.b32.xlu1 %v3979_v62, %s5853_s13 }
 0xadf   : > { %v3986_v10 = vpop.permute.xlu0 %3985 }
 0xae0   : > { %v3984_v17 = vpop.permute.xlu1 %3983  ;;  %v3988_v1 = vsel %vm2231_vm5, %v3986_v10, %v3976_v18 }
 0xae1   : > { %3993 = vrot.lane.b32.xlu0 %v3988_v1, %s5868_s0  ;;  %v3987_v11 = vsel %vm2231_vm5, %v3984_v17, %v3975_v7 }
 0xae2   : > { %3991 = vrot.lane.b32.xlu1 %v3987_v11, %s5868_s0  ;;  %s377_s0 = sand.u32 1, %s4890_s18  }
 0xae3   : > { %s4193_s29 = sshll.u32 %s377_s0, 4  ;;  %s5784_s14 = scalar_lea.sflag [#allocation3], %s377_s0 }
 0xae4   : > { %s379_s16 = scalar_lea.vmem [#allocation2], %s4193_s29  ;;  %s4842_s29 = scalar_lea.vmem %s4841_s24, 512 }
 0xae5   : > { %s4127_s12 = sshll.u32 %s379_s16, 4  ;;  %s5775_s12 = int_to_ptr.vmem [resolvable:$true] %s4127_s12 }
 0xae6   : > { %s4836_s25 = scalar_lea.vmem %s5775_s12, 256  ;;  %p4843_p0 = scmp.lt.s32.totalorder %s5775_s12, %s4841_s24 }
 0xae7   : > { %p4837_p11 = scmp.ne.s32.totalorder %s5775_s12, %s4836_s25  ;;  %p4844_p1 = scmp.lt.s32.totalorder %s4842_s29, %s4836_s25 }
 0xae9   : > { %p4838_p12 = pnand %p4837_p11, %p5025_p5  ;;  %p4845_p2 = por %p4844_p1, %p4843_p0 }
 0xaeb   : > { %p4839_p13 = pneg %p4838_p12 }
 0xaed   : > { %p4846_p3 = pnand %p4845_p2, %p4839_p13 }
 0xb53   : > { %v3994_v14 = vpop.permute.xlu0 %3993 }
 0xb54   : > { %v3998_v42 = vmax.f32 %v3976_v18, %v3994_v14  ;;  %v3992_v15 = vpop.permute.xlu1 %3991 }
 0xb55   : > { %v3997_v19 = vmax.f32 %v3975_v7, %v3992_v15 }
 0xb56   : > { %4002 = vrot.lane.b32.xlu0 %v3998_v42, %s5853_s13 }
 0xb57   : > { %3999 = vrot.lane.b32.xlu1 %v3997_v19, %s5853_s13  ;;  %s5780_s13 = scalar_lea.hbm %s5837_s11, %s4334_s15 }
 0xbc8   : > { %v4003_v27 = vpop.permute.xlu0 %4002 }
 0xbc9   : > { %v4000_v28 = vpop.permute.xlu1 %3999  ;;  %v4004_v30 = vsel %vm2231_vm5, %v4003_v27, %v3998_v42 }
 0xbca   : > { %4007 = vrot.lane.b32.xlu0 %v4004_v30, %s5869_s22  ;;  %v4001_v13 = vsel %vm2231_vm5, %v4000_v28, %v3997_v19 }
 0xbcb   : > { %4005 = vrot.lane.b32.xlu1 %v4001_v13, %s5869_s22 }
 0xc3c   : > { %v4008_v36 = vpop.permute.xlu0 %4007 }
 0xc3d   : > { %v4006_v37 = vpop.permute.xlu1 %4005  ;;  %v4010_v29 = vsel %vm2231_vm5, %v4008_v36, %v3998_v42 }
 0xc3e   : > { %4015 = vrot.lane.b32.xlu0 %v4010_v29, %s5861_s30  ;;  %v4009_v31 = vsel %vm2231_vm5, %v4006_v37, %v3997_v19 }
 0xc3f   : > { %4013 = vrot.lane.b32.xlu1 %v4009_v31, %s5861_s30 }
 0xcb0   : > { %v4016_v34 = vpop.permute.xlu0 %4015 }
 0xcb1   : > { %v4014_v41 = vpop.permute.xlu1 %4013  ;;  %v4020_v44 = vmax.f32 %v3998_v42, %v4016_v34 }
 0xcb2   : > { %v4019_v43 = vmax.f32 %v3997_v19, %v4014_v41 }
 0xcb4   : > { %4567 = vmatprep.mubr.msk.f32.mxu1 %vm4029_vm7, %v4019_v43 }
 0xcb5   : > { %4568 = vmatmul.mubr.msk.f32.vlgmr.msra.gmra.mrb[6].mxu1 %vm4029_vm7, %v4020_v44 }
 0xd88   : > { %v4569_v38 = vpop.f32.mrb[6].mxu1 }
 0xd89   : > { %4112 = vst.msk [vmem:[%s379_s16 + $0x8] sm:$0xff] %vm3128_vm6, %v4569_v38  ;;  %v4102_v39 = vpop.f32.mrb[7].mxu1 }
 0xd8a   : > { %4111 = vst.msk [vmem:[%s379_s16] sm:$0xff] %vm3128_vm6, %v4102_v39 }
 0xd8b   : > { %4849 = shalt.err (!%p4846_p3)
}
 0xd8c   : > { %s4850_s0 = scalar_lea.hbm %s5780_s13, 256  ;;  %s4854_s30 = scalar_lea.hbm %s5837_s11, 512 }
 0xd8d   : > { %p4851_p4 = scmp.ne.s32.totalorder %s5780_s13, %s4850_s0  ;;  %p4855_p9 = scmp.lt.u32.totalorder %s5780_s13, %s5837_s11 }
 0xd8e   : > { %p4856_p10 = scmp.lt.u32.totalorder %s4854_s30, %s4850_s0  ;;  %p4858_p12 = scmp.lt.u32.totalorder %s4850_s0, %s5780_s13 }
 0xd8f   : > { %p4852_p7 = pnand %p4851_p4, %p5025_p5 }
 0xd90   : > { %p4857_p11 = por %p4856_p10, %p4855_p9 }
 0xd91   : > { %p4853_p8 = pneg %p4852_p7 }
 0xd92   : > { %p4859_p13 = por %p4858_p12, %p4857_p11 }
 0xd94   : > { %p4860_p0 = pnand %p4859_p13, %p4853_p8 }
 0xd96   : > { %4863 = shalt.err (!%p4860_p0)
}
 0xd97   : > { %s4926_s25 = smov 128   ;;  %s5870_s24 = smov 8  }
 0xd98   : > { %4718 = dma.vmem_to_hbm [thread:$0]  (%p5025_p5), %s5775_s12, 256, %s5780_s13, %s5784_s14, %s4926_s25, %s4926_s25, %s5870_s24  }
 0xd99 PF: > { %p4724_p1 = scmp.ge.s32.totalorder %s4898_s20, 2  ;;  %s4142_s29 = sand.u32 1, %s4886_s17  }
 0xd9a   : > { %s4143_s0 = scalar_lea.sflag [#allocation3], %s4142_s29 }
 0xd9b   : > { %p4721_p2 = pnand %p4724_p1, %p5029_p6 }
 0xd9d   : > { %4881 = dma.done.wait (!%p4721_p2), %s4143_s0, 256  }
 0xd9e   : > { %4883 = vsyncadd (!%p4721_p2), %s4143_s0, 4294967040  ;;  %p21_p3 = scmp.ge.s32.totalorder %s5012_s23, 4   ;;  %s5871_s17 = smov %s4890_s18 }
 0xd9f   : > { %s5872_s18 = smov %s4894_s19  ;;  %s5873_s19 = smov %s5023_s26 }
 0xda0   : > { %s5874_s20 = smov %s5012_s23  ;;  %23 = sbr.rel (!%p21_p3) target bundleno = 5 (0x5), region = 131 }
 0xda7   :  { %4148 = vsyncpa [#allocation3], 1 }
 0xda8   :  { %4150 = vsyncpa [#allocation3 + $0x1], 1 }

</bundles_post_ra>
